<compile_context>
chip_gen: v7x
topology: tpu7x:2x2x1
jax: 0.10.0
libtpu: 0.0.40
codegen_flags: <defaults>
</compile_context>

<pallas_src>
import functools

import jax
import jax.numpy as jnp
from jax.experimental import pallas as pl
from jax.experimental.pallas import tpu as pltpu


# ----------------------------------------------------------------------------
# helpers
# ----------------------------------------------------------------------------
def _cdiv(a, b):
    return -(-a // b)


def _round_up(a, m):
    return _cdiv(a, m) * m


def _tpu_generation_info():
    """Static (trace-time) hardware hints: VMEM bytes, 2-TC chip, bf16-EUP chip."""
    kind = ""
    try:
        kind = jax.devices()[0].device_kind.lower()
    except Exception:
        pass
    two_cores = "v7" in kind
    bf16_gates = ("v6" in kind) or ("v7" in kind)
    vmem_bytes = 64 * 1024 * 1024 if two_cores else 128 * 1024 * 1024
    try:
        vmem_bytes = int(pltpu.get_tpu_info().vmem_capacity_bytes)
    except Exception:
        pass
    return vmem_bytes, two_cores, bf16_gates


# ----------------------------------------------------------------------------
# Pallas kernel: serial LSTM recurrence over one (batch tile, time block)
# ----------------------------------------------------------------------------
def _lstm_recurrence_kernel(gx_ref, bias_ref, whh_ref, h0_ref, c0_ref,
                            out_ref, hN_ref, cN_ref,
                            h_sc, c_sc,
                            *, t_real, time_padded, use_bf16_gates):
    """Grid point = (batch tile b, time block t): runs Tc sequential LSTM steps.

    gx_ref  : (Tc, tB, 4H) bf16  precomputed x @ W_ih^T for this block (streamed)
    bias_ref: (1, 4H)      f32   b_ih + b_hh (resident)
    whh_ref : (H, 4H)      bf16  hidden-to-hidden weights (resident)
    h0/c0   : (1, tB, H)   f32   initial hidden / cell state for this batch tile
    out_ref : (Tc, tB, H)        per-step hidden outputs
    hN/cN   : (1, tB, H)         final hidden / cell state (written at last block)
    h_sc    : (tB, H) bf16 VMEM scratch -- recurrent hidden carry (MXU operand)
    c_sc    : (tB, H) f32  VMEM scratch -- cell carry
    """
    t_blk = pl.program_id(1)
    Tc = gx_ref.shape[0]
    H = h_sc.shape[-1]

    # Re-initialize the carry at the first time block of EVERY batch tile
    # (time axis is innermost, so this is hit once per batch tile).
    @pl.when(t_blk == 0)
    def _():
        h_sc[...] = h0_ref[0].astype(jnp.bfloat16)
        c_sc[...] = c0_ref[0].astype(jnp.float32)

    whh = whh_ref[...]     # (H, 4H) bf16  -- hoisted out of the step loop
    bias = bias_ref[...]   # (1, 4H) f32   -- hoisted out of the step loop

    def step(s, carry):
        h_prev = h_sc[...]                                     # (tB, H) bf16
        c_prev = c_sc[...]                                     # (tB, H) f32
        # Recurrent matmul: bf16 operands straight from the carry, f32 accumulate.
        gates = (gx_ref[s].astype(jnp.float32) + bias
                 + jnp.dot(h_prev, whh,
                           preferred_element_type=jnp.float32))  # (tB, 4H) f32
        # Gate order (i, f, g, o) -- PyTorch nn.LSTM convention.
        if use_bf16_gates:
            # v6e / v7x: bf16 EUP path (~2x transcendental throughput).
            g16 = gates.astype(jnp.bfloat16)
            i_g = jax.nn.sigmoid(g16[:, 0 * H:1 * H])
            f_g = jax.nn.sigmoid(g16[:, 1 * H:2 * H])
            g_g = jnp.tanh(g16[:, 2 * H:3 * H])
            o_g = jax.nn.sigmoid(g16[:, 3 * H:4 * H])
            c_new = (f_g.astype(jnp.float32) * c_prev
                     + (i_g * g_g).astype(jnp.float32))
            h_new = (o_g.astype(jnp.float32)
                     * jnp.tanh(c_new.astype(jnp.bfloat16)).astype(jnp.float32))
        else:
            # v5e: no bf16 VPU/EUP -- keep gate math in f32.
            i_g = jax.nn.sigmoid(gates[:, 0 * H:1 * H])
            f_g = jax.nn.sigmoid(gates[:, 1 * H:2 * H])
            g_g = jnp.tanh(gates[:, 2 * H:3 * H])
            o_g = jax.nn.sigmoid(gates[:, 3 * H:4 * H])
            c_new = f_g * c_prev + i_g * g_g
            h_new = o_g * jnp.tanh(c_new)

        h_new_bf = h_new.astype(jnp.bfloat16)
        if time_padded:
            # Padded (past-the-end) timesteps must not advance the carry, so
            # that h_n / c_n reflect the last *real* step.
            valid = (t_blk * Tc + s) < t_real
            c_sc[...] = jnp.where(valid, c_new, c_prev)
            h_sc[...] = jnp.where(valid, h_new_bf, h_prev)
        else:
            c_sc[...] = c_new
            h_sc[...] = h_new_bf
        out_ref[s] = h_new.astype(out_ref.dtype)   # pad rows/steps sliced off later
        return carry

    jax.lax.fori_loop(0, Tc, step, 0, unroll=True)

    @pl.when(t_blk == pl.num_programs(1) - 1)
    def _():
        hN_ref[0] = h_sc[...].astype(hN_ref.dtype)
        cN_ref[0] = c_sc[...].astype(cN_ref.dtype)


# ----------------------------------------------------------------------------
# wrapper
# ----------------------------------------------------------------------------
@functools.partial(jax.jit, static_argnames=("batch_tile_cap", "time_block_cap"))
def lstm_forward_pallas(x, w_ih, w_hh, b_ih, b_hh, h0, c0,
                        *, batch_tile_cap=256, time_block_cap=32):
    """Single-layer LSTM over a time-major sequence.

    x    : (T, B, In) f32
    w_ih : (4H, In), w_hh : (4H, H), b_ih/b_hh : (4H,)   (PyTorch layout)
    h0/c0: (1, B, H)
    returns (out (T, B, H), (h_n (1, B, H), c_n (1, B, H)))
    """
    T, B, In = x.shape
    H = w_hh.shape[1]
    G = 4 * H

    vmem_bytes, two_cores, use_bf16_gates = _tpu_generation_info()

    # ---- tile selection (static under jit), padding-based ----
    # Batch: tB a multiple of 16 (bf16 sublane packing); on 2-TC chips force at
    # least two batch tiles (each >=128 rows) so the "parallel" axis shards.
    n_b = _cdiv(B, batch_tile_cap)
    if two_cores and B >= 256:
        n_b = max(n_b, 2)
    tB = _round_up(_cdiv(B, n_b), 16)
    B_pad = n_b * tB

    # Time: gx block budget per TPU generation (bigger on 128 MiB VMEM parts,
    # smaller on v7x's 64 MiB); pick Tc that minimizes time padding.
    gx_row_bytes = tB * G * 2                         # one timestep of bf16 gx
    budget = min(12 << 20, max(gx_row_bytes, vmem_bytes // 10))
    tc_cap = max(1, min(budget // gx_row_bytes, time_block_cap, T))
    n_t = _cdiv(T, tc_cap)
    Tc = _cdiv(T, n_t)
    T_pad = n_t * Tc

    # ---- pad inputs (pad x, not gx, to keep the pad copy cheap) ----
    if T_pad != T or B_pad != B:
        x = jnp.pad(x, ((0, T_pad - T), (0, B_pad - B), (0, 0)))
    if B_pad != B:
        h0 = jnp.pad(h0, ((0, 0), (0, B_pad - B), (0, 0)))
        c0 = jnp.pad(c0, ((0, 0), (0, B_pad - B), (0, 0)))

    # ---- phase 1 (hoisted, non-recurrent): gx = x @ W_ih^T, streamed in bf16 ----
    wih_t = jnp.transpose(w_ih).astype(jnp.bfloat16)            # (In, 4H)
    gx = jnp.dot(x.reshape(T_pad * B_pad, In).astype(jnp.bfloat16), wih_t,
                 preferred_element_type=jnp.float32)
    gx = gx.reshape(T_pad, B_pad, G).astype(jnp.bfloat16)       # (T, B, 4H) bf16
    bias = (b_ih + b_hh).astype(jnp.float32).reshape(1, G)      # (1, 4H) f32
    whh_t = jnp.transpose(w_hh).astype(jnp.bfloat16)            # (H, 4H) bf16

    grid = (n_b, n_t)   # batch (parallel) outer, time (recurrence) inner

    # VMEM budget derived from actual block sizes (+ headroom), per generation.
    gx_blk = Tc * tB * G * 2
    out_blk = Tc * tB * H * 4
    resident = H * G * 2 + 4 * (tB * H * 4) + G * 4   # whh + h0/c0/hN/cN + bias
    scratch = tB * H * (2 + 4)
    need = 2 * (gx_blk + out_blk + resident) + scratch
    vmem_limit = int(min(vmem_bytes * 3 // 4,
                         max(32 * 1024 * 1024, need + (8 << 20))))

    kernel = functools.partial(
        _lstm_recurrence_kernel,
        t_real=T, time_padded=(T_pad != T), use_bf16_gates=use_bf16_gates)

    # TODO(synk): pipeline_mode=pl.Buffered(1) on the grid-invariant blocks
    # (bias / W_hh / h0 / c0) would drop their second buffer on v7x.
    out, h_n, c_n = pl.pallas_call(
        kernel,
        out_shape=(
            jax.ShapeDtypeStruct((T_pad, B_pad, H), x.dtype),
            jax.ShapeDtypeStruct((1, B_pad, H), h0.dtype),
            jax.ShapeDtypeStruct((1, B_pad, H), c0.dtype),
        ),
        grid_spec=pltpu.PrefetchScalarGridSpec(
            num_scalar_prefetch=0,
            grid=grid,
            in_specs=[
                pl.BlockSpec((Tc, tB, G), lambda b, t: (t, b, 0)),   # gx (streamed, bf16)
                pl.BlockSpec((1, G), lambda b, t: (0, 0)),           # bias (resident)
                pl.BlockSpec((H, G), lambda b, t: (0, 0)),           # W_hh^T (resident)
                pl.BlockSpec((1, tB, H), lambda b, t: (0, b, 0)),    # h0
                pl.BlockSpec((1, tB, H), lambda b, t: (0, b, 0)),    # c0
            ],
            out_specs=[
                pl.BlockSpec((Tc, tB, H), lambda b, t: (t, b, 0)),   # per-step h
                pl.BlockSpec((1, tB, H), lambda b, t: (0, b, 0)),    # h_n
                pl.BlockSpec((1, tB, H), lambda b, t: (0, b, 0)),    # c_n
            ],
            scratch_shapes=[
                pltpu.VMEM((tB, H), jnp.bfloat16),   # h carry (MXU operand)
                pltpu.VMEM((tB, H), jnp.float32),    # c carry
            ],
        ),
        compiler_params=pltpu.CompilerParams(
            dimension_semantics=("parallel", "arbitrary"),
            vmem_limit_bytes=vmem_limit,
        ),
    )(gx, bias, whh_t, h0, c0)

    # Strip padding.
    out = out[:T, :B]
    h_n = h_n[:, :B]
    c_n = c_n[:, :B]
    return out, (h_n, c_n)


@jax.jit
def _lstm_single_step(x_t, w_ih, w_hh, b_ih, b_hh, h, c):
    """Fused XLA single LSTM step (seq_len == 1 inference path)."""
    H = w_hh.shape[1]
    gates = (jnp.dot(x_t, w_ih.T) + b_ih + jnp.dot(h[0], w_hh.T) + b_hh)
    i_g = jax.nn.sigmoid(gates[:, 0 * H:1 * H])
    f_g = jax.nn.sigmoid(gates[:, 1 * H:2 * H])
    g_g = jnp.tanh(gates[:, 2 * H:3 * H])
    o_g = jax.nn.sigmoid(gates[:, 3 * H:4 * H])
    c_new = f_g * c[0] + i_g * g_g
    h_new = o_g * jnp.tanh(c_new)
    return h_new[None], (h_new[None], c_new[None])


class MemoryPallas:
    """JAX/Pallas equivalent of rsl_rl Memory (type='lstm', num_layers=1)."""

    def __init__(self, input_size, hidden_size=256, key=None):
        self.input_size = input_size
        self.hidden_size = hidden_size
        key = jax.random.PRNGKey(0) if key is None else key
        k1, k2, k3, k4 = jax.random.split(key, 4)
        bound = 1.0 / jnp.sqrt(hidden_size)
        # PyTorch nn.LSTM parameter shapes, uniform(-1/sqrt(H), 1/sqrt(H)) init.
        self.w_ih = jax.random.uniform(k1, (4 * hidden_size, input_size),
                                       jnp.float32, -bound, bound)
        self.w_hh = jax.random.uniform(k2, (4 * hidden_size, hidden_size),
                                       jnp.float32, -bound, bound)
        self.b_ih = jax.random.uniform(k3, (4 * hidden_size,),
                                       jnp.float32, -bound, bound)
        self.b_hh = jax.random.uniform(k4, (4 * hidden_size,),
                                       jnp.float32, -bound, bound)
        self.hidden_states = None

    def forward(self, inputs, masks=None, hidden_states=None):
        batch_mode = masks is not None
        if batch_mode:
            if hidden_states is None:
                raise ValueError(
                    "Hidden states not passed to memory module during policy update")
            h0, c0 = hidden_states
            out, _ = lstm_forward_pallas(inputs, self.w_ih, self.w_hh,
                                         self.b_ih, self.b_hh, h0, c0)
            # TODO(synk): unpad_trajectories(out, masks) produces a data-dependent
            # ragged shape; it is pure index shuffling (no kernel compute) and is
            # left out here.
            return out
        else:
            B = inputs.shape[0]
            if self.hidden_states is None:
                h0 = jnp.zeros((1, B, self.hidden_size), jnp.float32)
                c0 = jnp.zeros((1, B, self.hidden_size), jnp.float32)
            else:
                h0, c0 = self.hidden_states
            out, self.hidden_states = _lstm_single_step(
                inputs, self.w_ih, self.w_hh, self.b_ih, self.b_hh, h0, c0)
            return out

    def reset(self, dones=None, hidden_states=None):
        if dones is None:
            self.hidden_states = hidden_states
        elif self.hidden_states is not None:
            if hidden_states is None:
                mask = (dones == 1)[None, :, None]
                self.hidden_states = tuple(
                    jnp.where(mask, 0.0, hs) for hs in self.hidden_states)
            else:
                raise NotImplementedError(
                    "Resetting hidden states of done environments with custom "
                    "hidden states is not implemented")


def _lstm_reference(x, w_ih, w_hh, b_ih, b_hh, h0, c0):
    """Pure-JAX (lax.scan, f32/HIGHEST) reference mirroring torch.nn.LSTM."""
    H = w_hh.shape[1]
    hp = jax.lax.Precision.HIGHEST

    def step(carry, x_t):
        h, c = carry
        gates = (jnp.dot(x_t, w_ih.T, precision=hp) + b_ih
                 + jnp.dot(h, w_hh.T, precision=hp) + b_hh)
        i = jax.nn.sigmoid(gates[:, 0 * H:1 * H])
        f = jax.nn.sigmoid(gates[:, 1 * H:2 * H])
        g = jnp.tanh(gates[:, 2 * H:3 * H])
        o = jax.nn.sigmoid(gates[:, 3 * H:4 * H])
        c = f * c + i * g
        h = o * jnp.tanh(c)
        return (h, c), h

    (h_n, c_n), out = jax.lax.scan(step, (h0[0], c0[0]), x)
    return out, (h_n[None], c_n[None])


if __name__ == "__main__":
    # Small shapes consistent with the module: seq=8, batch=8, input=32, hidden=32.
    T, B, In, H = 8, 8, 32, 32

    mem = MemoryPallas(input_size=In, hidden_size=H, key=jax.random.PRNGKey(0))

    kx, kh, kc = jax.random.split(jax.random.PRNGKey(1), 3)
    x = jax.random.normal(kx, (T, B, In), jnp.float32)
    h0 = jax.random.normal(kh, (1, B, H), jnp.float32)
    c0 = jax.random.normal(kc, (1, B, H), jnp.float32)
    masks = jnp.ones((T, B), jnp.float32)  # batch-mode (policy update) path

    # Batch mode (sequence LSTM) via the Pallas kernel.
    out = mem.forward(x, masks=masks, hidden_states=(h0, c0))
    out = jax.block_until_ready(out)

    # Inference mode (single step, stateful hidden) via the fused XLA path.
    step_out = mem.forward(x[0])  # (1, B, H)
    step_out = jax.block_until_ready(step_out)

    # Correctness vs. a pure-f32 reference of the PyTorch LSTM equations.
    # Tolerance is loosened vs. 1e-4 because streamed gx, the recurrent matmul
    # operands and (on v6e/v7x) the gate transcendentals are intentionally bf16.
    ref_out, _ = _lstm_reference(x, mem.w_ih, mem.w_hh, mem.b_ih, mem.b_hh, h0, c0)
    assert out.shape == (T, B, H)
    assert jnp.all(jnp.isfinite(out))
    assert jnp.allclose(out, ref_out, atol=5e-2, rtol=5e-2), "batch-mode mismatch"

    ref_step, _ = _lstm_reference(x[:1], mem.w_ih, mem.w_hh, mem.b_ih, mem.b_hh,
                                  jnp.zeros((1, B, H), jnp.float32),
                                  jnp.zeros((1, B, H), jnp.float32))
    assert step_out.shape == (1, B, H)
    assert jnp.allclose(step_out, ref_step, atol=5e-2, rtol=5e-2), "step mismatch"

    # Exercise the padded, multi-tile grid path: B=10 (not a multiple of 8/16)
    # and T=7 (not a multiple of Tc) with small caps -> grid (2, 2), batch and
    # time padding, per-tile scratch re-init and the pad-step carry mask.
    T2, B2 = 7, 10
    kx2, kh2, kc2 = jax.random.split(jax.random.PRNGKey(2), 3)
    x2 = jax.random.normal(kx2, (T2, B2, In), jnp.float32)
    h02 = jax.random.normal(kh2, (1, B2, H), jnp.float32)
    c02 = jax.random.normal(kc2, (1, B2, H), jnp.float32)
    out2, (hn2, cn2) = lstm_forward_pallas(
        x2, mem.w_ih, mem.w_hh, mem.b_ih, mem.b_hh, h02, c02,
        batch_tile_cap=8, time_block_cap=4)
    out2 = jax.block_until_ready(out2)
    ref_out2, (ref_hn2, ref_cn2) = _lstm_reference(
        x2, mem.w_ih, mem.w_hh, mem.b_ih, mem.b_hh, h02, c02)
    assert out2.shape == (T2, B2, H)
    assert jnp.allclose(out2, ref_out2, atol=5e-2, rtol=5e-2), "tiled-grid mismatch"
    assert jnp.allclose(hn2, ref_hn2, atol=5e-2, rtol=5e-2), "h_n mismatch"
    assert jnp.allclose(cn2, ref_cn2, atol=1e-1, rtol=5e-2), "c_n mismatch"

    print("KERNEL_OK")
</pallas_src>

<mosaic_0001>
module attributes {stable_mosaic.version = 11 : i64} {
  func.func @_lstm_recurrence_kernel(%arg0: i32, %arg1: i32, %arg2: memref<8x16x128xbf16, #tpu.memory_space<vmem>>, %arg3: memref<1x128xf32, #tpu.memory_space<vmem>>, %arg4: memref<32x128xbf16, #tpu.memory_space<vmem>>, %arg5: memref<1x16x32xf32, #tpu.memory_space<vmem>>, %arg6: memref<1x16x32xf32, #tpu.memory_space<vmem>>, %arg7: memref<8x16x32xf32, #tpu.memory_space<vmem>>, %arg8: memref<1x16x32xf32, #tpu.memory_space<vmem>>, %arg9: memref<1x16x32xf32, #tpu.memory_space<vmem>>, %arg10: memref<16x32xbf16, #tpu.memory_space<vmem>>, %arg11: memref<16x32xf32, #tpu.memory_space<vmem>>) attributes {dimension_semantics = [#tpu.dimension_semantics<parallel>, #tpu.dimension_semantics<arbitrary>], iteration_bounds = array<i64: 1, 1>, scalar_prefetch = 0 : i64, scratch_operands = 2 : i64, tpu.core_type = #tpu.core_type<tc>, window_params = [{transform_indices = @transform_0, window_bounds = array<i64: 8, 16, 128>}, {pipeline_mode = #tpu.pipeline_mode<synchronous>, transform_indices = @transform_1, window_bounds = array<i64: 1, 128>}, {pipeline_mode = #tpu.pipeline_mode<synchronous>, transform_indices = @transform_2, window_bounds = array<i64: 32, 128>}, {transform_indices = @transform_3, window_bounds = array<i64: 1, 16, 32>}, {transform_indices = @transform_4, window_bounds = array<i64: 1, 16, 32>}, {transform_indices = @transform_5, window_bounds = array<i64: 8, 16, 32>}, {transform_indices = @transform_6, window_bounds = array<i64: 1, 16, 32>}, {transform_indices = @transform_7, window_bounds = array<i64: 1, 16, 32>}]} {
    %c0_i32 = arith.constant 0 : i32
    %0 = arith.cmpi eq, %arg1, %c0_i32 : i32
    %1 = arith.extui %0 : i1 to i32
    %c0_i32_0 = arith.constant 0 : i32
    %2 = arith.cmpi ne, %1, %c0_i32_0 : i32
    scf.if %2 {
      %c0_134 = arith.constant 0 : index
      %c0_135 = arith.constant 0 : index
      %c0_136 = arith.constant 0 : index
      %344 = vector.load %arg5[%c0_134, %c0_135, %c0_136] : memref<1x16x32xf32, #tpu.memory_space<vmem>>, vector<1x16x32xf32>
      %345 = vector.shape_cast %344 : vector<1x16x32xf32> to vector<16x32xf32>
      %346 = arith.truncf %345 : vector<16x32xf32> to vector<16x32xbf16>
      %c0_137 = arith.constant 0 : index
      %c0_138 = arith.constant 0 : index
      %347 = vector.load %arg10[%c0_137, %c0_138] : memref<16x32xbf16, #tpu.memory_space<vmem>>, vector<16x32xbf16>
      tpu.vector_store %arg10[%c0_137, %c0_138], %346 {strides = array<i32>} : memref<16x32xbf16, #tpu.memory_space<vmem>>, vector<16x32xbf16>,
      %c0_139 = arith.constant 0 : index
      %c0_140 = arith.constant 0 : index
      %c0_141 = arith.constant 0 : index
      %348 = vector.load %arg6[%c0_139, %c0_140, %c0_141] : memref<1x16x32xf32, #tpu.memory_space<vmem>>, vector<1x16x32xf32>
      %349 = vector.shape_cast %348 : vector<1x16x32xf32> to vector<16x32xf32>
      %c0_142 = arith.constant 0 : index
      %c0_143 = arith.constant 0 : index
      %350 = vector.load %arg11[%c0_142, %c0_143] : memref<16x32xf32, #tpu.memory_space<vmem>>, vector<16x32xf32>
      tpu.vector_store %arg11[%c0_142, %c0_143], %349 {strides = array<i32>} : memref<16x32xf32, #tpu.memory_space<vmem>>, vector<16x32xf32>,
    } else {
    }
    %c0 = arith.constant 0 : index
    %c0_1 = arith.constant 0 : index
    %3 = vector.load %arg4[%c0, %c0_1] : memref<32x128xbf16, #tpu.memory_space<vmem>>, vector<32x128xbf16>
    %c0_2 = arith.constant 0 : index
    %c0_3 = arith.constant 0 : index
    %4 = vector.load %arg3[%c0_2, %c0_3] : memref<1x128xf32, #tpu.memory_space<vmem>>, vector<1x128xf32>
    %c0_i32_4 = arith.constant 0 : i32
    %c0_5 = arith.constant 0 : index
    %c0_6 = arith.constant 0 : index
    %5 = vector.load %arg10[%c0_5, %c0_6] : memref<16x32xbf16, #tpu.memory_space<vmem>>, vector<16x32xbf16>
    %c0_7 = arith.constant 0 : index
    %c0_8 = arith.constant 0 : index
    %6 = vector.load %arg11[%c0_7, %c0_8] : memref<16x32xf32, #tpu.memory_space<vmem>>, vector<16x32xf32>
    %7 = arith.index_cast %c0_i32_4 : i32 to index
    %c0_9 = arith.constant 0 : index
    %c0_10 = arith.constant 0 : index
    %8 = vector.load %arg2[%7, %c0_9, %c0_10] : memref<8x16x128xbf16, #tpu.memory_space<vmem>>, vector<1x16x128xbf16>
    %9 = vector.shape_cast %8 : vector<1x16x128xbf16> to vector<16x128xbf16>
    %10 = arith.extf %9 : vector<16x128xbf16> to vector<16x128xf32>
    %11 = vector.broadcast %4 : vector<1x128xf32> to vector<16x128xf32>
    %12 = arith.addf %10, %11 : vector<16x128xf32>
    %cst = arith.constant dense<0.000000e+00> : vector<16x128xf32>
    %13 = tpu.matmul %5, %3, %cst {dimension_numbers = #tpu.dot_dimension_numbers<[1], [0], [0], [1], [0, 0, 1, 1], [], []>} : vector<16x32xbf16>, vector<32x128xbf16>, vector<16x128xf32> -> vector<16x128xf32>
    %14 = arith.addf %12, %13 : vector<16x128xf32>
    %15 = vector.extract_strided_slice %14 {offsets = [0, 0], sizes = [16, 32], strides = [1, 1]} : vector<16x128xf32> to vector<16x32xf32>
    %16 = arith.negf %15 : vector<16x32xf32>
    %17 = math.exp %16 : vector<16x32xf32>
    %cst_11 = arith.constant 1.000000e+00 : f32
    %18 = vector.broadcast %cst_11 : f32 to vector<16x32xf32>
    %19 = arith.addf %18, %17 : vector<16x32xf32>
    %20 = arith.divf %18, %19 : vector<16x32xf32>
    %21 = vector.extract_strided_slice %14 {offsets = [0, 32], sizes = [16, 32], strides = [1, 1]} : vector<16x128xf32> to vector<16x32xf32>
    %22 = arith.negf %21 : vector<16x32xf32>
    %23 = math.exp %22 : vector<16x32xf32>
    %cst_12 = arith.constant 1.000000e+00 : f32
    %24 = vector.broadcast %cst_12 : f32 to vector<16x32xf32>
    %25 = arith.addf %24, %23 : vector<16x32xf32>
    %26 = arith.divf %24, %25 : vector<16x32xf32>
    %27 = vector.extract_strided_slice %14 {offsets = [0, 64], sizes = [16, 32], strides = [1, 1]} : vector<16x128xf32> to vector<16x32xf32>
    %28 = math.tanh %27 : vector<16x32xf32>
    %29 = vector.extract_strided_slice %14 {offsets = [0, 96], sizes = [16, 32], strides = [1, 1]} : vector<16x128xf32> to vector<16x32xf32>
    %30 = arith.negf %29 : vector<16x32xf32>
    %31 = math.exp %30 : vector<16x32xf32>
    %cst_13 = arith.constant 1.000000e+00 : f32
    %32 = vector.broadcast %cst_13 : f32 to vector<16x32xf32>
    %33 = arith.addf %32, %31 : vector<16x32xf32>
    %34 = arith.divf %32, %33 : vector<16x32xf32>
    %35 = arith.mulf %26, %6 : vector<16x32xf32>
    %36 = arith.mulf %20, %28 : vector<16x32xf32>
    %37 = arith.addf %35, %36 : vector<16x32xf32>
    %38 = math.tanh %37 : vector<16x32xf32>
    %39 = arith.mulf %34, %38 : vector<16x32xf32>
    %40 = arith.truncf %39 : vector<16x32xf32> to vector<16x32xbf16>
    %c0_14 = arith.constant 0 : index
    %c0_15 = arith.constant 0 : index
    %41 = vector.load %arg11[%c0_14, %c0_15] : memref<16x32xf32, #tpu.memory_space<vmem>>, vector<16x32xf32>
    tpu.vector_store %arg11[%c0_14, %c0_15], %37 {strides = array<i32>} : memref<16x32xf32, #tpu.memory_space<vmem>>, vector<16x32xf32>,
    %c0_16 = arith.constant 0 : index
    %c0_17 = arith.constant 0 : index
    %42 = vector.load %arg10[%c0_16, %c0_17] : memref<16x32xbf16, #tpu.memory_space<vmem>>, vector<16x32xbf16>
    tpu.vector_store %arg10[%c0_16, %c0_17], %40 {strides = array<i32>} : memref<16x32xbf16, #tpu.memory_space<vmem>>, vector<16x32xbf16>,
    %43 = arith.index_cast %c0_i32_4 : i32 to index
    %c0_18 = arith.constant 0 : index
    %c0_19 = arith.constant 0 : index
    %44 = vector.load %arg7[%43, %c0_18, %c0_19] : memref<8x16x32xf32, #tpu.memory_space<vmem>>, vector<1x16x32xf32>
    %45 = vector.shape_cast %44 : vector<1x16x32xf32> to vector<16x32xf32>
    %46 = vector.shape_cast %39 : vector<16x32xf32> to vector<1x16x32xf32>
    tpu.vector_store %arg7[%43, %c0_18, %c0_19], %46 {strides = array<i32>} : memref<8x16x32xf32, #tpu.memory_space<vmem>>, vector<1x16x32xf32>,
    %c1_i32 = arith.constant 1 : i32
    %c0_20 = arith.constant 0 : index
    %c0_21 = arith.constant 0 : index
    %47 = vector.load %arg10[%c0_20, %c0_21] : memref<16x32xbf16, #tpu.memory_space<vmem>>, vector<16x32xbf16>
    %c0_22 = arith.constant 0 : index
    %c0_23 = arith.constant 0 : index
    %48 = vector.load %arg11[%c0_22, %c0_23] : memref<16x32xf32, #tpu.memory_space<vmem>>, vector<16x32xf32>
    %49 = arith.index_cast %c1_i32 : i32 to index
    %c0_24 = arith.constant 0 : index
    %c0_25 = arith.constant 0 : index
    %50 = vector.load %arg2[%49, %c0_24, %c0_25] : memref<8x16x128xbf16, #tpu.memory_space<vmem>>, vector<1x16x128xbf16>
    %51 = vector.shape_cast %50 : vector<1x16x128xbf16> to vector<16x128xbf16>
    %52 = arith.extf %51 : vector<16x128xbf16> to vector<16x128xf32>
    %53 = vector.broadcast %4 : vector<1x128xf32> to vector<16x128xf32>
    %54 = arith.addf %52, %53 : vector<16x128xf32>
    %cst_26 = arith.constant dense<0.000000e+00> : vector<16x128xf32>
    %55 = tpu.matmul %47, %3, %cst_26 {dimension_numbers = #tpu.dot_dimension_numbers<[1], [0], [0], [1], [0, 0, 1, 1], [], []>} : vector<16x32xbf16>, vector<32x128xbf16>, vector<16x128xf32> -> vector<16x128xf32>
    %56 = arith.addf %54, %55 : vector<16x128xf32>
    %57 = vector.extract_strided_slice %56 {offsets = [0, 0], sizes = [16, 32], strides = [1, 1]} : vector<16x128xf32> to vector<16x32xf32>
    %58 = arith.negf %57 : vector<16x32xf32>
    %59 = math.exp %58 : vector<16x32xf32>
    %cst_27 = arith.constant 1.000000e+00 : f32
    %60 = vector.broadcast %cst_27 : f32 to vector<16x32xf32>
    %61 = arith.addf %60, %59 : vector<16x32xf32>
    %62 = arith.divf %60, %61 : vector<16x32xf32>
    %63 = vector.extract_strided_slice %56 {offsets = [0, 32], sizes = [16, 32], strides = [1, 1]} : vector<16x128xf32> to vector<16x32xf32>
    %64 = arith.negf %63 : vector<16x32xf32>
    %65 = math.exp %64 : vector<16x32xf32>
    %cst_28 = arith.constant 1.000000e+00 : f32
    %66 = vector.broadcast %cst_28 : f32 to vector<16x32xf32>
    %67 = arith.addf %66, %65 : vector<16x32xf32>
    %68 = arith.divf %66, %67 : vector<16x32xf32>
    %69 = vector.extract_strided_slice %56 {offsets = [0, 64], sizes = [16, 32], strides = [1, 1]} : vector<16x128xf32> to vector<16x32xf32>
    %70 = math.tanh %69 : vector<16x32xf32>
    %71 = vector.extract_strided_slice %56 {offsets = [0, 96], sizes = [16, 32], strides = [1, 1]} : vector<16x128xf32> to vector<16x32xf32>
    %72 = arith.negf %71 : vector<16x32xf32>
    %73 = math.exp %72 : vector<16x32xf32>
    %cst_29 = arith.constant 1.000000e+00 : f32
    %74 = vector.broadcast %cst_29 : f32 to vector<16x32xf32>
    %75 = arith.addf %74, %73 : vector<16x32xf32>
    %76 = arith.divf %74, %75 : vector<16x32xf32>
    %77 = arith.mulf %68, %48 : vector<16x32xf32>
    %78 = arith.mulf %62, %70 : vector<16x32xf32>
    %79 = arith.addf %77, %78 : vector<16x32xf32>
    %80 = math.tanh %79 : vector<16x32xf32>
    %81 = arith.mulf %76, %80 : vector<16x32xf32>
    %82 = arith.truncf %81 : vector<16x32xf32> to vector<16x32xbf16>
    %c0_30 = arith.constant 0 : index
    %c0_31 = arith.constant 0 : index
    %83 = vector.load %arg11[%c0_30, %c0_31] : memref<16x32xf32, #tpu.memory_space<vmem>>, vector<16x32xf32>
    tpu.vector_store %arg11[%c0_30, %c0_31], %79 {strides = array<i32>} : memref<16x32xf32, #tpu.memory_space<vmem>>, vector<16x32xf32>,
    %c0_32 = arith.constant 0 : index
    %c0_33 = arith.constant 0 : index
    %84 = vector.load %arg10[%c0_32, %c0_33] : memref<16x32xbf16, #tpu.memory_space<vmem>>, vector<16x32xbf16>
    tpu.vector_store %arg10[%c0_32, %c0_33], %82 {strides = array<i32>} : memref<16x32xbf16, #tpu.memory_space<vmem>>, vector<16x32xbf16>,
    %85 = arith.index_cast %c1_i32 : i32 to index
    %c0_34 = arith.constant 0 : index
    %c0_35 = arith.constant 0 : index
    %86 = vector.load %arg7[%85, %c0_34, %c0_35] : memref<8x16x32xf32, #tpu.memory_space<vmem>>, vector<1x16x32xf32>
    %87 = vector.shape_cast %86 : vector<1x16x32xf32> to vector<16x32xf32>
    %88 = vector.shape_cast %81 : vector<16x32xf32> to vector<1x16x32xf32>
    tpu.vector_store %arg7[%85, %c0_34, %c0_35], %88 {strides = array<i32>} : memref<8x16x32xf32, #tpu.memory_space<vmem>>, vector<1x16x32xf32>,
    %c2_i32 = arith.constant 2 : i32
    %c0_36 = arith.constant 0 : index
    %c0_37 = arith.constant 0 : index
    %89 = vector.load %arg10[%c0_36, %c0_37] : memref<16x32xbf16, #tpu.memory_space<vmem>>, vector<16x32xbf16>
    %c0_38 = arith.constant 0 : index
    %c0_39 = arith.constant 0 : index
    %90 = vector.load %arg11[%c0_38, %c0_39] : memref<16x32xf32, #tpu.memory_space<vmem>>, vector<16x32xf32>
    %91 = arith.index_cast %c2_i32 : i32 to index
    %c0_40 = arith.constant 0 : index
    %c0_41 = arith.constant 0 : index
    %92 = vector.load %arg2[%91, %c0_40, %c0_41] : memref<8x16x128xbf16, #tpu.memory_space<vmem>>, vector<1x16x128xbf16>
    %93 = vector.shape_cast %92 : vector<1x16x128xbf16> to vector<16x128xbf16>
    %94 = arith.extf %93 : vector<16x128xbf16> to vector<16x128xf32>
    %95 = vector.broadcast %4 : vector<1x128xf32> to vector<16x128xf32>
    %96 = arith.addf %94, %95 : vector<16x128xf32>
    %cst_42 = arith.constant dense<0.000000e+00> : vector<16x128xf32>
    %97 = tpu.matmul %89, %3, %cst_42 {dimension_numbers = #tpu.dot_dimension_numbers<[1], [0], [0], [1], [0, 0, 1, 1], [], []>} : vector<16x32xbf16>, vector<32x128xbf16>, vector<16x128xf32> -> vector<16x128xf32>
    %98 = arith.addf %96, %97 : vector<16x128xf32>
    %99 = vector.extract_strided_slice %98 {offsets = [0, 0], sizes = [16, 32], strides = [1, 1]} : vector<16x128xf32> to vector<16x32xf32>
    %100 = arith.negf %99 : vector<16x32xf32>
    %101 = math.exp %100 : vector<16x32xf32>
    %cst_43 = arith.constant 1.000000e+00 : f32
    %102 = vector.broadcast %cst_43 : f32 to vector<16x32xf32>
    %103 = arith.addf %102, %101 : vector<16x32xf32>
    %104 = arith.divf %102, %103 : vector<16x32xf32>
    %105 = vector.extract_strided_slice %98 {offsets = [0, 32], sizes = [16, 32], strides = [1, 1]} : vector<16x128xf32> to vector<16x32xf32>
    %106 = arith.negf %105 : vector<16x32xf32>
    %107 = math.exp %106 : vector<16x32xf32>
    %cst_44 = arith.constant 1.000000e+00 : f32
    %108 = vector.broadcast %cst_44 : f32 to vector<16x32xf32>
    %109 = arith.addf %108, %107 : vector<16x32xf32>
    %110 = arith.divf %108, %109 : vector<16x32xf32>
    %111 = vector.extract_strided_slice %98 {offsets = [0, 64], sizes = [16, 32], strides = [1, 1]} : vector<16x128xf32> to vector<16x32xf32>
    %112 = math.tanh %111 : vector<16x32xf32>
    %113 = vector.extract_strided_slice %98 {offsets = [0, 96], sizes = [16, 32], strides = [1, 1]} : vector<16x128xf32> to vector<16x32xf32>
    %114 = arith.negf %113 : vector<16x32xf32>
    %115 = math.exp %114 : vector<16x32xf32>
    %cst_45 = arith.constant 1.000000e+00 : f32
    %116 = vector.broadcast %cst_45 : f32 to vector<16x32xf32>
    %117 = arith.addf %116, %115 : vector<16x32xf32>
    %118 = arith.divf %116, %117 : vector<16x32xf32>
    %119 = arith.mulf %110, %90 : vector<16x32xf32>
    %120 = arith.mulf %104, %112 : vector<16x32xf32>
    %121 = arith.addf %119, %120 : vector<16x32xf32>
    %122 = math.tanh %121 : vector<16x32xf32>
    %123 = arith.mulf %118, %122 : vector<16x32xf32>
    %124 = arith.truncf %123 : vector<16x32xf32> to vector<16x32xbf16>
    %c0_46 = arith.constant 0 : index
    %c0_47 = arith.constant 0 : index
    %125 = vector.load %arg11[%c0_46, %c0_47] : memref<16x32xf32, #tpu.memory_space<vmem>>, vector<16x32xf32>
    tpu.vector_store %arg11[%c0_46, %c0_47], %121 {strides = array<i32>} : memref<16x32xf32, #tpu.memory_space<vmem>>, vector<16x32xf32>,
    %c0_48 = arith.constant 0 : index
    %c0_49 = arith.constant 0 : index
    %126 = vector.load %arg10[%c0_48, %c0_49] : memref<16x32xbf16, #tpu.memory_space<vmem>>, vector<16x32xbf16>
    tpu.vector_store %arg10[%c0_48, %c0_49], %124 {strides = array<i32>} : memref<16x32xbf16, #tpu.memory_space<vmem>>, vector<16x32xbf16>,
    %127 = arith.index_cast %c2_i32 : i32 to index
    %c0_50 = arith.constant 0 : index
    %c0_51 = arith.constant 0 : index
    %128 = vector.load %arg7[%127, %c0_50, %c0_51] : memref<8x16x32xf32, #tpu.memory_space<vmem>>, vector<1x16x32xf32>
    %129 = vector.shape_cast %128 : vector<1x16x32xf32> to vector<16x32xf32>
    %130 = vector.shape_cast %123 : vector<16x32xf32> to vector<1x16x32xf32>
    tpu.vector_store %arg7[%127, %c0_50, %c0_51], %130 {strides = array<i32>} : memref<8x16x32xf32, #tpu.memory_space<vmem>>, vector<1x16x32xf32>,
    %c3_i32 = arith.constant 3 : i32
    %c0_52 = arith.constant 0 : index
    %c0_53 = arith.constant 0 : index
    %131 = vector.load %arg10[%c0_52, %c0_53] : memref<16x32xbf16, #tpu.memory_space<vmem>>, vector<16x32xbf16>
    %c0_54 = arith.constant 0 : index
    %c0_55 = arith.constant 0 : index
    %132 = vector.load %arg11[%c0_54, %c0_55] : memref<16x32xf32, #tpu.memory_space<vmem>>, vector<16x32xf32>
    %133 = arith.index_cast %c3_i32 : i32 to index
    %c0_56 = arith.constant 0 : index
    %c0_57 = arith.constant 0 : index
    %134 = vector.load %arg2[%133, %c0_56, %c0_57] : memref<8x16x128xbf16, #tpu.memory_space<vmem>>, vector<1x16x128xbf16>
    %135 = vector.shape_cast %134 : vector<1x16x128xbf16> to vector<16x128xbf16>
    %136 = arith.extf %135 : vector<16x128xbf16> to vector<16x128xf32>
    %137 = vector.broadcast %4 : vector<1x128xf32> to vector<16x128xf32>
    %138 = arith.addf %136, %137 : vector<16x128xf32>
    %cst_58 = arith.constant dense<0.000000e+00> : vector<16x128xf32>
    %139 = tpu.matmul %131, %3, %cst_58 {dimension_numbers = #tpu.dot_dimension_numbers<[1], [0], [0], [1], [0, 0, 1, 1], [], []>} : vector<16x32xbf16>, vector<32x128xbf16>, vector<16x128xf32> -> vector<16x128xf32>
    %140 = arith.addf %138, %139 : vector<16x128xf32>
    %141 = vector.extract_strided_slice %140 {offsets = [0, 0], sizes = [16, 32], strides = [1, 1]} : vector<16x128xf32> to vector<16x32xf32>
    %142 = arith.negf %141 : vector<16x32xf32>
    %143 = math.exp %142 : vector<16x32xf32>
    %cst_59 = arith.constant 1.000000e+00 : f32
    %144 = vector.broadcast %cst_59 : f32 to vector<16x32xf32>
    %145 = arith.addf %144, %143 : vector<16x32xf32>
    %146 = arith.divf %144, %145 : vector<16x32xf32>
    %147 = vector.extract_strided_slice %140 {offsets = [0, 32], sizes = [16, 32], strides = [1, 1]} : vector<16x128xf32> to vector<16x32xf32>
    %148 = arith.negf %147 : vector<16x32xf32>
    %149 = math.exp %148 : vector<16x32xf32>
    %cst_60 = arith.constant 1.000000e+00 : f32
    %150 = vector.broadcast %cst_60 : f32 to vector<16x32xf32>
    %151 = arith.addf %150, %149 : vector<16x32xf32>
    %152 = arith.divf %150, %151 : vector<16x32xf32>
    %153 = vector.extract_strided_slice %140 {offsets = [0, 64], sizes = [16, 32], strides = [1, 1]} : vector<16x128xf32> to vector<16x32xf32>
    %154 = math.tanh %153 : vector<16x32xf32>
    %155 = vector.extract_strided_slice %140 {offsets = [0, 96], sizes = [16, 32], strides = [1, 1]} : vector<16x128xf32> to vector<16x32xf32>
    %156 = arith.negf %155 : vector<16x32xf32>
    %157 = math.exp %156 : vector<16x32xf32>
    %cst_61 = arith.constant 1.000000e+00 : f32
    %158 = vector.broadcast %cst_61 : f32 to vector<16x32xf32>
    %159 = arith.addf %158, %157 : vector<16x32xf32>
    %160 = arith.divf %158, %159 : vector<16x32xf32>
    %161 = arith.mulf %152, %132 : vector<16x32xf32>
    %162 = arith.mulf %146, %154 : vector<16x32xf32>
    %163 = arith.addf %161, %162 : vector<16x32xf32>
    %164 = math.tanh %163 : vector<16x32xf32>
    %165 = arith.mulf %160, %164 : vector<16x32xf32>
    %166 = arith.truncf %165 : vector<16x32xf32> to vector<16x32xbf16>
    %c0_62 = arith.constant 0 : index
    %c0_63 = arith.constant 0 : index
    %167 = vector.load %arg11[%c0_62, %c0_63] : memref<16x32xf32, #tpu.memory_space<vmem>>, vector<16x32xf32>
    tpu.vector_store %arg11[%c0_62, %c0_63], %163 {strides = array<i32>} : memref<16x32xf32, #tpu.memory_space<vmem>>, vector<16x32xf32>,
    %c0_64 = arith.constant 0 : index
    %c0_65 = arith.constant 0 : index
    %168 = vector.load %arg10[%c0_64, %c0_65] : memref<16x32xbf16, #tpu.memory_space<vmem>>, vector<16x32xbf16>
    tpu.vector_store %arg10[%c0_64, %c0_65], %166 {strides = array<i32>} : memref<16x32xbf16, #tpu.memory_space<vmem>>, vector<16x32xbf16>,
    %169 = arith.index_cast %c3_i32 : i32 to index
    %c0_66 = arith.constant 0 : index
    %c0_67 = arith.constant 0 : index
    %170 = vector.load %arg7[%169, %c0_66, %c0_67] : memref<8x16x32xf32, #tpu.memory_space<vmem>>, vector<1x16x32xf32>
    %171 = vector.shape_cast %170 : vector<1x16x32xf32> to vector<16x32xf32>
    %172 = vector.shape_cast %165 : vector<16x32xf32> to vector<1x16x32xf32>
    tpu.vector_store %arg7[%169, %c0_66, %c0_67], %172 {strides = array<i32>} : memref<8x16x32xf32, #tpu.memory_space<vmem>>, vector<1x16x32xf32>,
    %c4_i32 = arith.constant 4 : i32
    %c0_68 = arith.constant 0 : index
    %c0_69 = arith.constant 0 : index
    %173 = vector.load %arg10[%c0_68, %c0_69] : memref<16x32xbf16, #tpu.memory_space<vmem>>, vector<16x32xbf16>
    %c0_70 = arith.constant 0 : index
    %c0_71 = arith.constant 0 : index
    %174 = vector.load %arg11[%c0_70, %c0_71] : memref<16x32xf32, #tpu.memory_space<vmem>>, vector<16x32xf32>
    %175 = arith.index_cast %c4_i32 : i32 to index
    %c0_72 = arith.constant 0 : index
    %c0_73 = arith.constant 0 : index
    %176 = vector.load %arg2[%175, %c0_72, %c0_73] : memref<8x16x128xbf16, #tpu.memory_space<vmem>>, vector<1x16x128xbf16>
    %177 = vector.shape_cast %176 : vector<1x16x128xbf16> to vector<16x128xbf16>
    %178 = arith.extf %177 : vector<16x128xbf16> to vector<16x128xf32>
    %179 = vector.broadcast %4 : vector<1x128xf32> to vector<16x128xf32>
    %180 = arith.addf %178, %179 : vector<16x128xf32>
    %cst_74 = arith.constant dense<0.000000e+00> : vector<16x128xf32>
    %181 = tpu.matmul %173, %3, %cst_74 {dimension_numbers = #tpu.dot_dimension_numbers<[1], [0], [0], [1], [0, 0, 1, 1], [], []>} : vector<16x32xbf16>, vector<32x128xbf16>, vector<16x128xf32> -> vector<16x128xf32>
    %182 = arith.addf %180, %181 : vector<16x128xf32>
    %183 = vector.extract_strided_slice %182 {offsets = [0, 0], sizes = [16, 32], strides = [1, 1]} : vector<16x128xf32> to vector<16x32xf32>
    %184 = arith.negf %183 : vector<16x32xf32>
    %185 = math.exp %184 : vector<16x32xf32>
    %cst_75 = arith.constant 1.000000e+00 : f32
    %186 = vector.broadcast %cst_75 : f32 to vector<16x32xf32>
    %187 = arith.addf %186, %185 : vector<16x32xf32>
    %188 = arith.divf %186, %187 : vector<16x32xf32>
    %189 = vector.extract_strided_slice %182 {offsets = [0, 32], sizes = [16, 32], strides = [1, 1]} : vector<16x128xf32> to vector<16x32xf32>
    %190 = arith.negf %189 : vector<16x32xf32>
    %191 = math.exp %190 : vector<16x32xf32>
    %cst_76 = arith.constant 1.000000e+00 : f32
    %192 = vector.broadcast %cst_76 : f32 to vector<16x32xf32>
    %193 = arith.addf %192, %191 : vector<16x32xf32>
    %194 = arith.divf %192, %193 : vector<16x32xf32>
    %195 = vector.extract_strided_slice %182 {offsets = [0, 64], sizes = [16, 32], strides = [1, 1]} : vector<16x128xf32> to vector<16x32xf32>
    %196 = math.tanh %195 : vector<16x32xf32>
    %197 = vector.extract_strided_slice %182 {offsets = [0, 96], sizes = [16, 32], strides = [1, 1]} : vector<16x128xf32> to vector<16x32xf32>
    %198 = arith.negf %197 : vector<16x32xf32>
    %199 = math.exp %198 : vector<16x32xf32>
    %cst_77 = arith.constant 1.000000e+00 : f32
    %200 = vector.broadcast %cst_77 : f32 to vector<16x32xf32>
    %201 = arith.addf %200, %199 : vector<16x32xf32>
    %202 = arith.divf %200, %201 : vector<16x32xf32>
    %203 = arith.mulf %194, %174 : vector<16x32xf32>
    %204 = arith.mulf %188, %196 : vector<16x32xf32>
    %205 = arith.addf %203, %204 : vector<16x32xf32>
    %206 = math.tanh %205 : vector<16x32xf32>
    %207 = arith.mulf %202, %206 : vector<16x32xf32>
    %208 = arith.truncf %207 : vector<16x32xf32> to vector<16x32xbf16>
    %c0_78 = arith.constant 0 : index
    %c0_79 = arith.constant 0 : index
    %209 = vector.load %arg11[%c0_78, %c0_79] : memref<16x32xf32, #tpu.memory_space<vmem>>, vector<16x32xf32>
    tpu.vector_store %arg11[%c0_78, %c0_79], %205 {strides = array<i32>} : memref<16x32xf32, #tpu.memory_space<vmem>>, vector<16x32xf32>,
    %c0_80 = arith.constant 0 : index
    %c0_81 = arith.constant 0 : index
    %210 = vector.load %arg10[%c0_80, %c0_81] : memref<16x32xbf16, #tpu.memory_space<vmem>>, vector<16x32xbf16>
    tpu.vector_store %arg10[%c0_80, %c0_81], %208 {strides = array<i32>} : memref<16x32xbf16, #tpu.memory_space<vmem>>, vector<16x32xbf16>,
    %211 = arith.index_cast %c4_i32 : i32 to index
    %c0_82 = arith.constant 0 : index
    %c0_83 = arith.constant 0 : index
    %212 = vector.load %arg7[%211, %c0_82, %c0_83] : memref<8x16x32xf32, #tpu.memory_space<vmem>>, vector<1x16x32xf32>
    %213 = vector.shape_cast %212 : vector<1x16x32xf32> to vector<16x32xf32>
    %214 = vector.shape_cast %207 : vector<16x32xf32> to vector<1x16x32xf32>
    tpu.vector_store %arg7[%211, %c0_82, %c0_83], %214 {strides = array<i32>} : memref<8x16x32xf32, #tpu.memory_space<vmem>>, vector<1x16x32xf32>,
    %c5_i32 = arith.constant 5 : i32
    %c0_84 = arith.constant 0 : index
    %c0_85 = arith.constant 0 : index
    %215 = vector.load %arg10[%c0_84, %c0_85] : memref<16x32xbf16, #tpu.memory_space<vmem>>, vector<16x32xbf16>
    %c0_86 = arith.constant 0 : index
    %c0_87 = arith.constant 0 : index
    %216 = vector.load %arg11[%c0_86, %c0_87] : memref<16x32xf32, #tpu.memory_space<vmem>>, vector<16x32xf32>
    %217 = arith.index_cast %c5_i32 : i32 to index
    %c0_88 = arith.constant 0 : index
    %c0_89 = arith.constant 0 : index
    %218 = vector.load %arg2[%217, %c0_88, %c0_89] : memref<8x16x128xbf16, #tpu.memory_space<vmem>>, vector<1x16x128xbf16>
    %219 = vector.shape_cast %218 : vector<1x16x128xbf16> to vector<16x128xbf16>
    %220 = arith.extf %219 : vector<16x128xbf16> to vector<16x128xf32>
    %221 = vector.broadcast %4 : vector<1x128xf32> to vector<16x128xf32>
    %222 = arith.addf %220, %221 : vector<16x128xf32>
    %cst_90 = arith.constant dense<0.000000e+00> : vector<16x128xf32>
    %223 = tpu.matmul %215, %3, %cst_90 {dimension_numbers = #tpu.dot_dimension_numbers<[1], [0], [0], [1], [0, 0, 1, 1], [], []>} : vector<16x32xbf16>, vector<32x128xbf16>, vector<16x128xf32> -> vector<16x128xf32>
    %224 = arith.addf %222, %223 : vector<16x128xf32>
    %225 = vector.extract_strided_slice %224 {offsets = [0, 0], sizes = [16, 32], strides = [1, 1]} : vector<16x128xf32> to vector<16x32xf32>
    %226 = arith.negf %225 : vector<16x32xf32>
    %227 = math.exp %226 : vector<16x32xf32>
    %cst_91 = arith.constant 1.000000e+00 : f32
    %228 = vector.broadcast %cst_91 : f32 to vector<16x32xf32>
    %229 = arith.addf %228, %227 : vector<16x32xf32>
    %230 = arith.divf %228, %229 : vector<16x32xf32>
    %231 = vector.extract_strided_slice %224 {offsets = [0, 32], sizes = [16, 32], strides = [1, 1]} : vector<16x128xf32> to vector<16x32xf32>
    %232 = arith.negf %231 : vector<16x32xf32>
    %233 = math.exp %232 : vector<16x32xf32>
    %cst_92 = arith.constant 1.000000e+00 : f32
    %234 = vector.broadcast %cst_92 : f32 to vector<16x32xf32>
    %235 = arith.addf %234, %233 : vector<16x32xf32>
    %236 = arith.divf %234, %235 : vector<16x32xf32>
    %237 = vector.extract_strided_slice %224 {offsets = [0, 64], sizes = [16, 32], strides = [1, 1]} : vector<16x128xf32> to vector<16x32xf32>
    %238 = math.tanh %237 : vector<16x32xf32>
    %239 = vector.extract_strided_slice %224 {offsets = [0, 96], sizes = [16, 32], strides = [1, 1]} : vector<16x128xf32> to vector<16x32xf32>
    %240 = arith.negf %239 : vector<16x32xf32>
    %241 = math.exp %240 : vector<16x32xf32>
    %cst_93 = arith.constant 1.000000e+00 : f32
    %242 = vector.broadcast %cst_93 : f32 to vector<16x32xf32>
    %243 = arith.addf %242, %241 : vector<16x32xf32>
    %244 = arith.divf %242, %243 : vector<16x32xf32>
    %245 = arith.mulf %236, %216 : vector<16x32xf32>
    %246 = arith.mulf %230, %238 : vector<16x32xf32>
    %247 = arith.addf %245, %246 : vector<16x32xf32>
    %248 = math.tanh %247 : vector<16x32xf32>
    %249 = arith.mulf %244, %248 : vector<16x32xf32>
    %250 = arith.truncf %249 : vector<16x32xf32> to vector<16x32xbf16>
    %c0_94 = arith.constant 0 : index
    %c0_95 = arith.constant 0 : index
    %251 = vector.load %arg11[%c0_94, %c0_95] : memref<16x32xf32, #tpu.memory_space<vmem>>, vector<16x32xf32>
    tpu.vector_store %arg11[%c0_94, %c0_95], %247 {strides = array<i32>} : memref<16x32xf32, #tpu.memory_space<vmem>>, vector<16x32xf32>,
    %c0_96 = arith.constant 0 : index
    %c0_97 = arith.constant 0 : index
    %252 = vector.load %arg10[%c0_96, %c0_97] : memref<16x32xbf16, #tpu.memory_space<vmem>>, vector<16x32xbf16>
    tpu.vector_store %arg10[%c0_96, %c0_97], %250 {strides = array<i32>} : memref<16x32xbf16, #tpu.memory_space<vmem>>, vector<16x32xbf16>,
    %253 = arith.index_cast %c5_i32 : i32 to index
    %c0_98 = arith.constant 0 : index
    %c0_99 = arith.constant 0 : index
    %254 = vector.load %arg7[%253, %c0_98, %c0_99] : memref<8x16x32xf32, #tpu.memory_space<vmem>>, vector<1x16x32xf32>
    %255 = vector.shape_cast %254 : vector<1x16x32xf32> to vector<16x32xf32>
    %256 = vector.shape_cast %249 : vector<16x32xf32> to vector<1x16x32xf32>
    tpu.vector_store %arg7[%253, %c0_98, %c0_99], %256 {strides = array<i32>} : memref<8x16x32xf32, #tpu.memory_space<vmem>>, vector<1x16x32xf32>,
    %c6_i32 = arith.constant 6 : i32
    %c0_100 = arith.constant 0 : index
    %c0_101 = arith.constant 0 : index
    %257 = vector.load %arg10[%c0_100, %c0_101] : memref<16x32xbf16, #tpu.memory_space<vmem>>, vector<16x32xbf16>
    %c0_102 = arith.constant 0 : index
    %c0_103 = arith.constant 0 : index
    %258 = vector.load %arg11[%c0_102, %c0_103] : memref<16x32xf32, #tpu.memory_space<vmem>>, vector<16x32xf32>
    %259 = arith.index_cast %c6_i32 : i32 to index
    %c0_104 = arith.constant 0 : index
    %c0_105 = arith.constant 0 : index
    %260 = vector.load %arg2[%259, %c0_104, %c0_105] : memref<8x16x128xbf16, #tpu.memory_space<vmem>>, vector<1x16x128xbf16>
    %261 = vector.shape_cast %260 : vector<1x16x128xbf16> to vector<16x128xbf16>
    %262 = arith.extf %261 : vector<16x128xbf16> to vector<16x128xf32>
    %263 = vector.broadcast %4 : vector<1x128xf32> to vector<16x128xf32>
    %264 = arith.addf %262, %263 : vector<16x128xf32>
    %cst_106 = arith.constant dense<0.000000e+00> : vector<16x128xf32>
    %265 = tpu.matmul %257, %3, %cst_106 {dimension_numbers = #tpu.dot_dimension_numbers<[1], [0], [0], [1], [0, 0, 1, 1], [], []>} : vector<16x32xbf16>, vector<32x128xbf16>, vector<16x128xf32> -> vector<16x128xf32>
    %266 = arith.addf %264, %265 : vector<16x128xf32>
    %267 = vector.extract_strided_slice %266 {offsets = [0, 0], sizes = [16, 32], strides = [1, 1]} : vector<16x128xf32> to vector<16x32xf32>
    %268 = arith.negf %267 : vector<16x32xf32>
    %269 = math.exp %268 : vector<16x32xf32>
    %cst_107 = arith.constant 1.000000e+00 : f32
    %270 = vector.broadcast %cst_107 : f32 to vector<16x32xf32>
    %271 = arith.addf %270, %269 : vector<16x32xf32>
    %272 = arith.divf %270, %271 : vector<16x32xf32>
    %273 = vector.extract_strided_slice %266 {offsets = [0, 32], sizes = [16, 32], strides = [1, 1]} : vector<16x128xf32> to vector<16x32xf32>
    %274 = arith.negf %273 : vector<16x32xf32>
    %275 = math.exp %274 : vector<16x32xf32>
    %cst_108 = arith.constant 1.000000e+00 : f32
    %276 = vector.broadcast %cst_108 : f32 to vector<16x32xf32>
    %277 = arith.addf %276, %275 : vector<16x32xf32>
    %278 = arith.divf %276, %277 : vector<16x32xf32>
    %279 = vector.extract_strided_slice %266 {offsets = [0, 64], sizes = [16, 32], strides = [1, 1]} : vector<16x128xf32> to vector<16x32xf32>
    %280 = math.tanh %279 : vector<16x32xf32>
    %281 = vector.extract_strided_slice %266 {offsets = [0, 96], sizes = [16, 32], strides = [1, 1]} : vector<16x128xf32> to vector<16x32xf32>
    %282 = arith.negf %281 : vector<16x32xf32>
    %283 = math.exp %282 : vector<16x32xf32>
    %cst_109 = arith.constant 1.000000e+00 : f32
    %284 = vector.broadcast %cst_109 : f32 to vector<16x32xf32>
    %285 = arith.addf %284, %283 : vector<16x32xf32>
    %286 = arith.divf %284, %285 : vector<16x32xf32>
    %287 = arith.mulf %278, %258 : vector<16x32xf32>
    %288 = arith.mulf %272, %280 : vector<16x32xf32>
    %289 = arith.addf %287, %288 : vector<16x32xf32>
    %290 = math.tanh %289 : vector<16x32xf32>
    %291 = arith.mulf %286, %290 : vector<16x32xf32>
    %292 = arith.truncf %291 : vector<16x32xf32> to vector<16x32xbf16>
    %c0_110 = arith.constant 0 : index
    %c0_111 = arith.constant 0 : index
    %293 = vector.load %arg11[%c0_110, %c0_111] : memref<16x32xf32, #tpu.memory_space<vmem>>, vector<16x32xf32>
    tpu.vector_store %arg11[%c0_110, %c0_111], %289 {strides = array<i32>} : memref<16x32xf32, #tpu.memory_space<vmem>>, vector<16x32xf32>,
    %c0_112 = arith.constant 0 : index
    %c0_113 = arith.constant 0 : index
    %294 = vector.load %arg10[%c0_112, %c0_113] : memref<16x32xbf16, #tpu.memory_space<vmem>>, vector<16x32xbf16>
    tpu.vector_store %arg10[%c0_112, %c0_113], %292 {strides = array<i32>} : memref<16x32xbf16, #tpu.memory_space<vmem>>, vector<16x32xbf16>,
    %295 = arith.index_cast %c6_i32 : i32 to index
    %c0_114 = arith.constant 0 : index
    %c0_115 = arith.constant 0 : index
    %296 = vector.load %arg7[%295, %c0_114, %c0_115] : memref<8x16x32xf32, #tpu.memory_space<vmem>>, vector<1x16x32xf32>
    %297 = vector.shape_cast %296 : vector<1x16x32xf32> to vector<16x32xf32>
    %298 = vector.shape_cast %291 : vector<16x32xf32> to vector<1x16x32xf32>
    tpu.vector_store %arg7[%295, %c0_114, %c0_115], %298 {strides = array<i32>} : memref<8x16x32xf32, #tpu.memory_space<vmem>>, vector<1x16x32xf32>,
    %c7_i32 = arith.constant 7 : i32
    %c0_116 = arith.constant 0 : index
    %c0_117 = arith.constant 0 : index
    %299 = vector.load %arg10[%c0_116, %c0_117] : memref<16x32xbf16, #tpu.memory_space<vmem>>, vector<16x32xbf16>
    %c0_118 = arith.constant 0 : index
    %c0_119 = arith.constant 0 : index
    %300 = vector.load %arg11[%c0_118, %c0_119] : memref<16x32xf32, #tpu.memory_space<vmem>>, vector<16x32xf32>
    %301 = arith.index_cast %c7_i32 : i32 to index
    %c0_120 = arith.constant 0 : index
    %c0_121 = arith.constant 0 : index
    %302 = vector.load %arg2[%301, %c0_120, %c0_121] : memref<8x16x128xbf16, #tpu.memory_space<vmem>>, vector<1x16x128xbf16>
    %303 = vector.shape_cast %302 : vector<1x16x128xbf16> to vector<16x128xbf16>
    %304 = arith.extf %303 : vector<16x128xbf16> to vector<16x128xf32>
    %305 = vector.broadcast %4 : vector<1x128xf32> to vector<16x128xf32>
    %306 = arith.addf %304, %305 : vector<16x128xf32>
    %cst_122 = arith.constant dense<0.000000e+00> : vector<16x128xf32>
    %307 = tpu.matmul %299, %3, %cst_122 {dimension_numbers = #tpu.dot_dimension_numbers<[1], [0], [0], [1], [0, 0, 1, 1], [], []>} : vector<16x32xbf16>, vector<32x128xbf16>, vector<16x128xf32> -> vector<16x128xf32>
    %308 = arith.addf %306, %307 : vector<16x128xf32>
    %309 = vector.extract_strided_slice %308 {offsets = [0, 0], sizes = [16, 32], strides = [1, 1]} : vector<16x128xf32> to vector<16x32xf32>
    %310 = arith.negf %309 : vector<16x32xf32>
    %311 = math.exp %310 : vector<16x32xf32>
    %cst_123 = arith.constant 1.000000e+00 : f32
    %312 = vector.broadcast %cst_123 : f32 to vector<16x32xf32>
    %313 = arith.addf %312, %311 : vector<16x32xf32>
    %314 = arith.divf %312, %313 : vector<16x32xf32>
    %315 = vector.extract_strided_slice %308 {offsets = [0, 32], sizes = [16, 32], strides = [1, 1]} : vector<16x128xf32> to vector<16x32xf32>
    %316 = arith.negf %315 : vector<16x32xf32>
    %317 = math.exp %316 : vector<16x32xf32>
    %cst_124 = arith.constant 1.000000e+00 : f32
    %318 = vector.broadcast %cst_124 : f32 to vector<16x32xf32>
    %319 = arith.addf %318, %317 : vector<16x32xf32>
    %320 = arith.divf %318, %319 : vector<16x32xf32>
    %321 = vector.extract_strided_slice %308 {offsets = [0, 64], sizes = [16, 32], strides = [1, 1]} : vector<16x128xf32> to vector<16x32xf32>
    %322 = math.tanh %321 : vector<16x32xf32>
    %323 = vector.extract_strided_slice %308 {offsets = [0, 96], sizes = [16, 32], strides = [1, 1]} : vector<16x128xf32> to vector<16x32xf32>
    %324 = arith.negf %323 : vector<16x32xf32>
    %325 = math.exp %324 : vector<16x32xf32>
    %cst_125 = arith.constant 1.000000e+00 : f32
    %326 = vector.broadcast %cst_125 : f32 to vector<16x32xf32>
    %327 = arith.addf %326, %325 : vector<16x32xf32>
    %328 = arith.divf %326, %327 : vector<16x32xf32>
    %329 = arith.mulf %320, %300 : vector<16x32xf32>
    %330 = arith.mulf %314, %322 : vector<16x32xf32>
    %331 = arith.addf %329, %330 : vector<16x32xf32>
    %332 = math.tanh %331 : vector<16x32xf32>
    %333 = arith.mulf %328, %332 : vector<16x32xf32>
    %334 = arith.truncf %333 : vector<16x32xf32> to vector<16x32xbf16>
    %c0_126 = arith.constant 0 : index
    %c0_127 = arith.constant 0 : index
    %335 = vector.load %arg11[%c0_126, %c0_127] : memref<16x32xf32, #tpu.memory_space<vmem>>, vector<16x32xf32>
    tpu.vector_store %arg11[%c0_126, %c0_127], %331 {strides = array<i32>} : memref<16x32xf32, #tpu.memory_space<vmem>>, vector<16x32xf32>,
    %c0_128 = arith.constant 0 : index
    %c0_129 = arith.constant 0 : index
    %336 = vector.load %arg10[%c0_128, %c0_129] : memref<16x32xbf16, #tpu.memory_space<vmem>>, vector<16x32xbf16>
    tpu.vector_store %arg10[%c0_128, %c0_129], %334 {strides = array<i32>} : memref<16x32xbf16, #tpu.memory_space<vmem>>, vector<16x32xbf16>,
    %337 = arith.index_cast %c7_i32 : i32 to index
    %c0_130 = arith.constant 0 : index
    %c0_131 = arith.constant 0 : index
    %338 = vector.load %arg7[%337, %c0_130, %c0_131] : memref<8x16x32xf32, #tpu.memory_space<vmem>>, vector<1x16x32xf32>
    %339 = vector.shape_cast %338 : vector<1x16x32xf32> to vector<16x32xf32>
    %340 = vector.shape_cast %333 : vector<16x32xf32> to vector<1x16x32xf32>
    tpu.vector_store %arg7[%337, %c0_130, %c0_131], %340 {strides = array<i32>} : memref<8x16x32xf32, #tpu.memory_space<vmem>>, vector<1x16x32xf32>,
    %c8_i32 = arith.constant 8 : i32
    %c0_i32_132 = arith.constant 0 : i32
    %341 = arith.cmpi eq, %arg1, %c0_i32_132 : i32
    %342 = arith.extui %341 : i1 to i32
    %c0_i32_133 = arith.constant 0 : i32
    %343 = arith.cmpi ne, %342, %c0_i32_133 : i32
    scf.if %343 {
      %c0_134 = arith.constant 0 : index
      %c0_135 = arith.constant 0 : index
      %344 = vector.load %arg10[%c0_134, %c0_135] : memref<16x32xbf16, #tpu.memory_space<vmem>>, vector<16x32xbf16>
      %345 = arith.extf %344 : vector<16x32xbf16> to vector<16x32xf32>
      %c0_136 = arith.constant 0 : index
      %c0_137 = arith.constant 0 : index
      %c0_138 = arith.constant 0 : index
      %346 = vector.load %arg8[%c0_136, %c0_137, %c0_138] : memref<1x16x32xf32, #tpu.memory_space<vmem>>, vector<1x16x32xf32>
      %347 = vector.shape_cast %346 : vector<1x16x32xf32> to vector<16x32xf32>
      %348 = vector.shape_cast %345 : vector<16x32xf32> to vector<1x16x32xf32>
      tpu.vector_store %arg8[%c0_136, %c0_137, %c0_138], %348 {strides = array<i32>} : memref<1x16x32xf32, #tpu.memory_space<vmem>>, vector<1x16x32xf32>,
      %c0_139 = arith.constant 0 : index
      %c0_140 = arith.constant 0 : index
      %349 = vector.load %arg11[%c0_139, %c0_140] : memref<16x32xf32, #tpu.memory_space<vmem>>, vector<16x32xf32>
      %c0_141 = arith.constant 0 : index
      %c0_142 = arith.constant 0 : index
      %c0_143 = arith.constant 0 : index
      %350 = vector.load %arg9[%c0_141, %c0_142, %c0_143] : memref<1x16x32xf32, #tpu.memory_space<vmem>>, vector<1x16x32xf32>
      %351 = vector.shape_cast %350 : vector<1x16x32xf32> to vector<16x32xf32>
      %352 = vector.shape_cast %349 : vector<16x32xf32> to vector<1x16x32xf32>
      tpu.vector_store %arg9[%c0_141, %c0_142, %c0_143], %352 {strides = array<i32>} : memref<1x16x32xf32, #tpu.memory_space<vmem>>, vector<1x16x32xf32>,
    } else {
    }
    return
  }
  func.func @transform_0(%arg0: i32, %arg1: i32) -> (i32, i32, i32) {
    %c0_i32 = arith.constant 0 : i32
    %c0_i32_0 = arith.constant 0 : i32
    return %arg1, %arg0, %c0_i32 : i32, i32, i32
  }
  func.func @transform_1(%arg0: i32, %arg1: i32) -> (i32, i32) {
    %c0_i32 = arith.constant 0 : i32
    %c0_i32_0 = arith.constant 0 : i32
    %c0_i32_1 = arith.constant 0 : i32
    return %c0_i32, %c0_i32_0 : i32, i32
  }
  func.func @transform_2(%arg0: i32, %arg1: i32) -> (i32, i32) {
    %c0_i32 = arith.constant 0 : i32
    %c0_i32_0 = arith.constant 0 : i32
    %c0_i32_1 = arith.constant 0 : i32
    return %c0_i32, %c0_i32_0 : i32, i32
  }
  func.func @transform_3(%arg0: i32, %arg1: i32) -> (i32, i32, i32) {
    %c0_i32 = arith.constant 0 : i32
    %c0_i32_0 = arith.constant 0 : i32
    %c0_i32_1 = arith.constant 0 : i32
    return %c0_i32, %arg0, %c0_i32_0 : i32, i32, i32
  }
  func.func @transform_4(%arg0: i32, %arg1: i32) -> (i32, i32, i32) {
    %c0_i32 = arith.constant 0 : i32
    %c0_i32_0 = arith.constant 0 : i32
    %c0_i32_1 = arith.constant 0 : i32
    return %c0_i32, %arg0, %c0_i32_0 : i32, i32, i32
  }
  func.func @transform_5(%arg0: i32, %arg1: i32) -> (i32, i32, i32) {
    %c0_i32 = arith.constant 0 : i32
    %c0_i32_0 = arith.constant 0 : i32
    return %arg1, %arg0, %c0_i32 : i32, i32, i32
  }
  func.func @transform_6(%arg0: i32, %arg1: i32) -> (i32, i32, i32) {
    %c0_i32 = arith.constant 0 : i32
    %c0_i32_0 = arith.constant 0 : i32
    %c0_i32_1 = arith.constant 0 : i32
    return %c0_i32, %arg0, %c0_i32_0 : i32, i32, i32
  }
  func.func @transform_7(%arg0: i32, %arg1: i32) -> (i32, i32, i32) {
    %c0_i32 = arith.constant 0 : i32
    %c0_i32_0 = arith.constant 0 : i32
    %c0_i32_1 = arith.constant 0 : i32
    return %c0_i32, %arg0, %c0_i32_0 : i32, i32, i32
  }
}

</mosaic_0001>

<bundles_post_ra>
// kernel: lstm_forward_pallas.1
= control target key start
LH: loop header
LB: loop body
LE: loop exit
PB: predicated region body
PF: predicated region fallthrough
CT: control target
= control target key end

     0   :  { %v1512_v0 = vmov 0.0   ;;  %vm1513_vm0 = vmmov 0   ;;  %vm31_vm1 = vcmask 261120   ;;  %s1515_s15 = smov 64   ;;  %s1947_s2 = inlined_call_operand.vmem [shape: bf16[32,128], index: 2, kind: input, shape index: {}]   ;;  %s1948_s3 = inlined_call_operand.vmem [shape: f32[1,16,32], index: 3, kind: input, shape index: {}]   ;;  %s1949_s4 = inlined_call_operand.vmem [shape: f32[1,16,32], index: 4, kind: input, shape index: {}]   ;;  %s1950_s0 = inlined_call_operand.vmem [shape: bf16[8,16,128], index: 0, kind: input, shape index: {}]   ;;  %s1951_s1 = inlined_call_operand.vmem [shape: f32[1,128], index: 1, kind: input, shape index: {}]   ;;  %s1952_s5 = inlined_call_operand.vmem [shape: f32[8,16,32], index: 5, kind: output, shape index: {0}]   ;;  %s1953_s7 = inlined_call_operand.vmem [shape: f32[1,16,32], index: 7, kind: output, shape index: {2}]   ;;  %s1954_s6 = inlined_call_operand.vmem [shape: f32[1,16,32], index: 6, kind: output, shape index: {1}]  }
   0x1   :  { %1313 = vmatprep.subr.bf16.mxu0 %v1512_v0  ;;  %v1561_v1 = vld [vmem:[%s1947_s2] sm:$0xff]   ;;  %1317 = vmatprep.mubr.msk.bf16.mxu0 %vm1513_vm0, %v1512_v0  ;;  %v1568_v2 = vld [vmem:[%s1947_s2 + $0x8] sm:$0xff]  }
   0x2   :  { %1321 = vmatprep.subr.bf16.mxu1 %v1512_v0  ;;  %1325 = vmatprep.mubr.msk.bf16.mxu1 %vm1513_vm0, %v1512_v0  ;;  %v28_v3 = vld [vmem:[%s1948_s3] sm:$0xff]  ;;  %v29_v4 = vld [vmem:[%s1948_s3 + $0x8] sm:$0xff]  ;;  %s1514_s3 = smov 32  }
   0x3   :  { %1314 = vmatpush3.bf16.msra.mxu0 %v1561_v1  ;;  %v33_v5 = vld [vmem:[%s1949_s4] sm:$0xff]  ;;  %1322 = vmatpush3.bf16.msra.mxu1 %v1561_v1  ;;  %v30_v6 = vpack.c.bf16 %v29_v4, %v28_v3  ;;  %v34_v7 = vld [vmem:[%s1949_s4 + $0x8] sm:$0xff] }
   0x4   :  { %1315 = vmatprep.subr.bf16.mxu0 %v1512_v0  ;;  %35 = vst.msk [vmem:[#allocation3] sm:$0xff] %vm31_vm1, %v33_v5  ;;  %1323 = vmatprep.subr.bf16.mxu1 %v1512_v0  ;;  %36 = vst.msk [vmem:[#allocation3 + $0x8] sm:$0xff] %vm31_vm1, %v34_v7  ;;  %v1251_v11 = vld [vmem:[%s1950_s0] sm:$0xff]   ;;  %v1282_v56 = vld [vmem:[%s1950_s0 + $0x8] sm:$0xff]  }
   0x5   :  { %32 = vst.msk [vmem:[#allocation2] sm:$0xff] %vm31_vm1, %v30_v6  ;;  %v1252_v12 = vunpack.c.l.bf16 %v1251_v11  ;;  %v1611_v13 = vld [vmem:[%s1951_s1] ss:$0 sm:$0xff]  ;;  %v1253_v14 = vunpack.c.h.bf16 %v1251_v11  ;;  %s1516_s1 = smov 96   ;;  %v1256_v57 = vunpack.c.l.bf16 %v1282_v56  ;;  %v1257_v58 = vunpack.c.h.bf16 %v1282_v56 }
   0x7   :  { %1316 = vmatpush3.bf16.msra.mxu0 %v1568_v2  ;;  %1324 = vmatpush3.bf16.msra.mxu1 %v1568_v2  ;;  %v55_v15 = vadd.f32 %v1252_v12, %v1611_v13  ;;  %v56_v16 = vadd.f32 %v1253_v14, %v1611_v13  ;;  %v206_v59 = vadd.f32 %v1256_v57, %v1611_v13 }
   0x8   :  { %1329 = vmatprep.subr.bf16.mxu0 %v1512_v0  ;;  %1337 = vmatprep.subr.bf16.mxu1 %v1512_v0  ;;  %v207_v60 = vadd.f32 %v1257_v58, %v1611_v13 }
   0xb   :  { %v43_v8 = vld [vmem:[#allocation3] sm:$0xff]  ;;  %v44_v10 = vld [vmem:[#allocation3 + $0x8] sm:$0xff] }
   0xc   :  { %132 = vrot.lane.b32.xlu1 %v43_v8, %s1514_s3  ;;  %v42_v9 = vld [vmem:[#allocation2] sm:$0xff] }
   0xd   :  { %1318 = vmatmul.mubr.msk.bf16.vlgmr.msra.gmra.mrb[0].mxu0 %vm31_vm1, %v42_v9 }
   0xe   :  { %1330 = vmatpush3.bf16.msra.mxu0 %v1561_v1  ;;  %1333 = vmatprep.mubr.msk.bf16.mxu0 %vm1513_vm0, %v1512_v0 }
   0xf   :  { %1331 = vmatprep.subr.bf16.mxu0 %v1512_v0 }
  0x10   :  { %134 = vrot.lane.b32.xlu1 %v44_v10, %s1514_s3 }
  0x12   :  { %1332 = vmatpush3.bf16.msra.mxu0 %v1568_v2 }
  0x13   :  { %1345 = vmatprep.subr.bf16.mxu0 %v1512_v0 }
  0x7e   :  { %v133_v37 = vpop.permute.xlu1 %132 }
  0x82   :  { %v135_v39 = vpop.permute.xlu1 %134 }
  0xe0   :  { %v107_v17 = vpop.f32.mrb[0].mxu0 }
  0xe1   :  { %v114_v18 = vadd.f32 %v107_v17, %v55_v15  ;;  %v1319_v19 = vpop.f32.mrb[1].mxu0 }
  0xe2   :  { %v110_v20 = vpop.f32.mrb[2].mxu0 }
  0xe3   :  { %1384 = vtanh.f32 %v114_v18  ;;  %v115_v21 = vadd.f32 %v110_v20, %v56_v16  ;;  %v1320_v22 = vpop.f32.mrb[3].mxu0  ;;  %v1199_v25 = vmul.f32 -1.442695, %v114_v18 }
  0xe5   :  { %1386 = vtanh.f32 %v115_v21  ;;  %v1200_v26 = vmul.f32 -1.442695, %v115_v21 }
  0xe6   :  { %1388 = vpow2.f32 %v1199_v25 }
  0xe7   :  { %1390 = vpow2.f32 %v1200_v26 }
  0xed   :  { %v1385_v23 = vpop.eup %1384 }
  0xee   :  { %142 = vrot.lane.b32.xlu0 %v1385_v23, %s1515_s15 }
  0xef   :  { %v1387_v24 = vpop.eup %1386 }
  0xf0   :  { %v1389_v27 = vpop.eup %1388 }
  0xf1   :  { %v122_v28 = vadd.f32 1.0, %v1389_v27  ;;  %v1391_v29 = vpop.eup %1390 }
  0xf2   :  { %144 = vrot.lane.b32.xlu0 %v1387_v24, %s1515_s15  ;;  %v123_v30 = vadd.f32 1.0, %v1391_v29 }
  0xf3   :  { %1392 = vrcp.f32 %v122_v28 }
  0xf4   :  { %1394 = vrcp.f32 %v123_v30 }
  0xfd   :  { %v1393_v31 = vpop.eup %1392 }
  0xfe   :  { %v1395_v34 = vpop.eup %1394  ;;  %v138_v38 = vmul.f32 %v1393_v31, %v133_v37 }
  0xff   :  { %v139_v42 = vmul.f32 %v1395_v34, %v135_v39 }
 0x160   :  { %v143_v32 = vpop.permute.xlu0 %142 }
 0x161   :  { %v148_v33 = vmul.f32 %v1393_v31, %v143_v32 }
 0x163   :  { %152 = vrot.lane.b32.xlu0 %v148_v33, %s1514_s3 }
 0x164   :  { %v145_v35 = vpop.permute.xlu0 %144 }
 0x165   :  { %v149_v36 = vmul.f32 %v1395_v34, %v145_v35 }
 0x167   :  { %154 = vrot.lane.b32.xlu1 %v149_v36, %s1514_s3 }
 0x1d5   :  { %v153_v40 = vpop.permute.xlu0 %152 }
 0x1d6   :  { %v158_v41 = vadd.f32 %v153_v40, %v138_v38 }
 0x1d8   :  { %1396 = vtanh.f32 %v158_v41 }
 0x1d9   :  { %v155_v43 = vpop.permute.xlu1 %154 }
 0x1da   :  { %v159_v44 = vadd.f32 %v155_v43, %v139_v42  ;;  %v1283_v42 = vld [vmem:[%s1950_s0 + $0x10] sm:$0xff]  }
 0x1db   :  { %v1260_v43 = vunpack.c.l.bf16 %v1283_v42 }
 0x1dc   :  { %1398 = vtanh.f32 %v159_v44 }
 0x1e2   :  { %v1397_v45 = vpop.eup %1396 }
 0x1e3   :  { %164 = vrot.lane.b32.xlu0 %v1397_v45, %s1515_s15  ;;  %v345_v45 = vadd.f32 %v1260_v43, %v1611_v13 }
 0x1e6   :  { %v1399_v46 = vpop.eup %1398 }
 0x1e7   :  { %166 = vrot.lane.b32.xlu1 %v1399_v46, %s1515_s15 }
 0x1eb   :  { %175 = vrot.lane.b32.xlu1 %v158_v41, %s1516_s1 }
 0x255   :  { %v165_v47 = vpop.permute.xlu0 %164 }
 0x256   :  { %v1622_v49 = vmul.f32 %v1393_v31, %v165_v47 }
 0x259   :  { %v167_v48 = vpop.permute.xlu1 %166 }
 0x25a   :  { %v1624_v50 = vmul.f32 %v1395_v34, %v167_v48 }
 0x25c   :  { %v172_v51 = vpack.c.bf16 %v1624_v50, %v1622_v49 }
 0x25d   :  { %v176_v52 = vpop.permute.xlu1 %175 }
 0x25e   :  { %181 = vst.msk [vmem:[#allocation3] sm:$0xff] %vm31_vm1, %v176_v52  ;;  %184 = vrot.lane.b32.xlu0 %v172_v51, %s1514_s3 }
 0x262   :  { %177 = vrot.lane.b32.xlu0 %v159_v44, %s1516_s1  ;;  %v1261_v44 = vunpack.c.h.bf16 %v1283_v42 }
 0x264   :  { %v346_v46 = vadd.f32 %v1261_v44, %v1611_v13 }
 0x265   :  { %v199_v8 = vld [vmem:[#allocation3] sm:$0xff] }
 0x2d0   :  { %v185_v53 = vpop.permute.xlu0 %184 }
 0x2d1   :  { %187 = vst.msk [vmem:[#allocation2] sm:$0xff] %vm31_vm1, %v185_v53 }
 0x2d4   :  { %v178_v54 = vpop.permute.xlu0 %177 }
 0x2d5   :  { %182 = vst.msk [vmem:[#allocation3 + $0x8] sm:$0xff] %vm31_vm1, %v178_v54 }
 0x2d8   :  { %v198_v55 = vld [vmem:[#allocation2] sm:$0xff] }
 0x2d9   :  { %1326 = vmatmul.mubr.msk.bf16.vlgmr.msra.gmra.mrb[0].mxu1 %vm31_vm1, %v198_v55 }
 0x2da   :  { %1338 = vmatpush3.bf16.msra.mxu1 %v1561_v1  ;;  %1341 = vmatprep.mubr.msk.bf16.mxu1 %vm1513_vm0, %v1512_v0 }
 0x2db   :  { %1339 = vmatprep.subr.bf16.mxu1 %v1512_v0 }
 0x2dc   :  { %v200_v9 = vld [vmem:[#allocation3 + $0x8] sm:$0xff] }
 0x2de   :  { %1340 = vmatpush3.bf16.msra.mxu1 %v1568_v2 }
 0x2df   :  { %1353 = vmatprep.subr.bf16.mxu1 %v1512_v0 }
 0x3ac   :  { %v245_v61 = vpop.f32.mrb[0].mxu1 }
 0x3ad   :  { %v252_v62 = vadd.f32 %v245_v61, %v206_v59  ;;  %v1327_v63 = vpop.f32.mrb[1].mxu1 }
 0x3ae   :  { %v248_v3 = vpop.f32.mrb[2].mxu1 }
 0x3af   :  { %1400 = vtanh.f32 %v252_v62  ;;  %v253_v4 = vadd.f32 %v248_v3, %v207_v60  ;;  %v1328_v5 = vpop.f32.mrb[3].mxu1  ;;  %v1204_v10 = vmul.f32 -1.442695, %v252_v62 }
 0x3b1   :  { %1402 = vtanh.f32 %v253_v4  ;;  %v1205_v11 = vmul.f32 -1.442695, %v253_v4 }
 0x3b2   :  { %1404 = vpow2.f32 %v1204_v10 }
 0x3b3   :  { %1406 = vpow2.f32 %v1205_v11 }
 0x3b9   :  { %v1401_v6 = vpop.eup %1400 }
 0x3ba   :  { %280 = vrot.lane.b32.xlu1 %v1401_v6, %s1515_s15 }
 0x3bb   :  { %v1403_v7 = vpop.eup %1402 }
 0x3bc   :  { %282 = vrot.lane.b32.xlu0 %v1403_v7, %s1515_s15  ;;  %v1405_v12 = vpop.eup %1404 }
 0x3bd   :  { %v1407_v14 = vpop.eup %1406  ;;  %v260_v15 = vadd.f32 1.0, %v1405_v12 }
 0x3be   :  { %270 = vrot.lane.b32.xlu1 %v199_v8, %s1514_s3  ;;  %v261_v16 = vadd.f32 1.0, %v1407_v14 }
 0x3bf   :  { %1408 = vrcp.f32 %v260_v15 }
 0x3c0   :  { %272 = vrot.lane.b32.xlu0 %v200_v9, %s1514_s3  ;;  %1410 = vrcp.f32 %v261_v16 }
 0x3c9   :  { %v1409_v17 = vpop.eup %1408 }
 0x3ca   :  { %v1411_v20 = vpop.eup %1410 }
 0x42c   :  { %v281_v18 = vpop.permute.xlu1 %280 }
 0x42d   :  { %v286_v19 = vmul.f32 %v1409_v17, %v281_v18 }
 0x42e   :  { %v283_v21 = vpop.permute.xlu0 %282 }
 0x42f   :  { %290 = vrot.lane.b32.xlu1 %v286_v19, %s1514_s3  ;;  %v287_v22 = vmul.f32 %v1411_v20, %v283_v21 }
 0x430   :  { %v271_v23 = vpop.permute.xlu1 %270 }
 0x431   :  { %292 = vrot.lane.b32.xlu0 %v287_v22, %s1514_s3  ;;  %v276_v24 = vmul.f32 %v1409_v17, %v271_v23 }
 0x432   :  { %v273_v25 = vpop.permute.xlu0 %272 }
 0x433   :  { %v277_v28 = vmul.f32 %v1411_v20, %v273_v25 }
 0x4a1   :  { %v291_v26 = vpop.permute.xlu1 %290 }
 0x4a2   :  { %v296_v27 = vadd.f32 %v291_v26, %v276_v24 }
 0x4a3   :  { %v293_v29 = vpop.permute.xlu0 %292 }
 0x4a4   :  { %1412 = vtanh.f32 %v296_v27  ;;  %v297_v30 = vadd.f32 %v293_v29, %v277_v28 }
 0x4a6   :  { %1414 = vtanh.f32 %v297_v30 }
 0x4ae   :  { %v1413_v31 = vpop.eup %1412 }
 0x4af   :  { %302 = vrot.lane.b32.xlu1 %v1413_v31, %s1515_s15 }
 0x4b0   :  { %v1415_v32 = vpop.eup %1414 }
 0x4b1   :  { %304 = vrot.lane.b32.xlu0 %v1415_v32, %s1515_s15 }
 0x4b5   :  { %313 = vrot.lane.b32.xlu0 %v296_v27, %s1516_s1 }
 0x521   :  { %v303_v33 = vpop.permute.xlu1 %302 }
 0x522   :  { %v1654_v35 = vmul.f32 %v1409_v17, %v303_v33 }
 0x523   :  { %v305_v34 = vpop.permute.xlu0 %304 }
 0x524   :  { %v1656_v36 = vmul.f32 %v1411_v20, %v305_v34 }
 0x526   :  { %v310_v37 = vpack.c.bf16 %v1656_v36, %v1654_v35 }
 0x527   :  { %v314_v38 = vpop.permute.xlu0 %313 }
 0x528   :  { %319 = vst.msk [vmem:[#allocation3] sm:$0xff] %vm31_vm1, %v314_v38  ;;  %322 = vrot.lane.b32.xlu1 %v310_v37, %s1514_s3 }
 0x52c   :  { %315 = vrot.lane.b32.xlu1 %v297_v30, %s1516_s1  ;;  %v1284_v30 = vld [vmem:[%s1950_s0 + $0x18] sm:$0xff]  }
 0x52d   :  { %v1264_v31 = vunpack.c.l.bf16 %v1284_v30  ;;  %v1265_v32 = vunpack.c.h.bf16 %v1284_v30 }
 0x52f   :  { %v338_v57 = vld [vmem:[#allocation3] sm:$0xff]  ;;  %v484_v33 = vadd.f32 %v1264_v31, %v1611_v13  ;;  %v485_v34 = vadd.f32 %v1265_v32, %v1611_v13 }
 0x59a   :  { %v323_v39 = vpop.permute.xlu1 %322 }
 0x59b   :  { %325 = vst.msk [vmem:[#allocation2] sm:$0xff] %vm31_vm1, %v323_v39 }
 0x59e   :  { %v316_v40 = vpop.permute.xlu1 %315 }
 0x59f   :  { %320 = vst.msk [vmem:[#allocation3 + $0x8] sm:$0xff] %vm31_vm1, %v316_v40 }
 0x5a2   :  { %v337_v41 = vld [vmem:[#allocation2] sm:$0xff] }
 0x5a3   :  { %1334 = vmatmul.mubr.msk.bf16.vlgmr.msra.gmra.mrb[4].mxu0 %vm31_vm1, %v337_v41 }
 0x5a4   :  { %1346 = vmatpush3.bf16.msra.mxu0 %v1561_v1  ;;  %1349 = vmatprep.mubr.msk.bf16.mxu0 %vm1513_vm0, %v1512_v0 }
 0x5a5   :  { %1347 = vmatprep.subr.bf16.mxu0 %v1512_v0 }
 0x5a6   :  { %v339_v58 = vld [vmem:[#allocation3 + $0x8] sm:$0xff] }
 0x5a8   :  { %1348 = vmatpush3.bf16.msra.mxu0 %v1568_v2 }
 0x5a9   :  { %1361 = vmatprep.subr.bf16.mxu0 %v1512_v0 }
 0x676   :  { %v384_v47 = vpop.f32.mrb[4].mxu0 }
 0x677   :  { %v391_v48 = vadd.f32 %v384_v47, %v345_v45  ;;  %v1335_v51 = vpop.f32.mrb[5].mxu0 }
 0x678   :  { %v387_v52 = vpop.f32.mrb[6].mxu0 }
 0x679   :  { %1416 = vtanh.f32 %v391_v48  ;;  %v392_v53 = vadd.f32 %v387_v52, %v346_v46  ;;  %v1336_v54 = vpop.f32.mrb[7].mxu0  ;;  %v1211_v59 = vmul.f32 -1.442695, %v391_v48 }
 0x67b   :  { %1418 = vtanh.f32 %v392_v53  ;;  %v1212_v60 = vmul.f32 -1.442695, %v392_v53 }
 0x67c   :  { %1420 = vpow2.f32 %v1211_v59 }
 0x67d   :  { %1422 = vpow2.f32 %v1212_v60 }
 0x683   :  { %v1417_v55 = vpop.eup %1416 }
 0x684   :  { %419 = vrot.lane.b32.xlu0 %v1417_v55, %s1515_s15 }
 0x685   :  { %v1419_v56 = vpop.eup %1418 }
 0x686   :  { %421 = vrot.lane.b32.xlu1 %v1419_v56, %s1515_s15  ;;  %v1421_v61 = vpop.eup %1420 }
 0x687   :  { %v1423_v62 = vpop.eup %1422  ;;  %v399_v63 = vadd.f32 1.0, %v1421_v61 }
 0x688   :  { %409 = vrot.lane.b32.xlu0 %v338_v57, %s1514_s3  ;;  %v400_v3 = vadd.f32 1.0, %v1423_v62 }
 0x689   :  { %1424 = vrcp.f32 %v399_v63 }
 0x68a   :  { %411 = vrot.lane.b32.xlu1 %v339_v58, %s1514_s3  ;;  %1426 = vrcp.f32 %v400_v3 }
 0x693   :  { %v1425_v4 = vpop.eup %1424 }
 0x694   :  { %v1427_v7 = vpop.eup %1426 }
 0x6f6   :  { %v420_v5 = vpop.permute.xlu0 %419 }
 0x6f7   :  { %v425_v6 = vmul.f32 %v1425_v4, %v420_v5 }
 0x6f8   :  { %v422_v8 = vpop.permute.xlu1 %421 }
 0x6f9   :  { %429 = vrot.lane.b32.xlu0 %v425_v6, %s1514_s3  ;;  %v426_v9 = vmul.f32 %v1427_v7, %v422_v8 }
 0x6fa   :  { %v410_v10 = vpop.permute.xlu0 %409 }
 0x6fb   :  { %431 = vrot.lane.b32.xlu1 %v426_v9, %s1514_s3  ;;  %v415_v11 = vmul.f32 %v1425_v4, %v410_v10 }
 0x6fc   :  { %v412_v12 = vpop.permute.xlu1 %411 }
 0x6fd   :  { %v416_v16 = vmul.f32 %v1427_v7, %v412_v12 }
 0x76b   :  { %v430_v14 = vpop.permute.xlu0 %429 }
 0x76c   :  { %v435_v15 = vadd.f32 %v430_v14, %v415_v11 }
 0x76d   :  { %v432_v17 = vpop.permute.xlu1 %431 }
 0x76e   :  { %1428 = vtanh.f32 %v435_v15  ;;  %v436_v18 = vadd.f32 %v432_v17, %v416_v16 }
 0x770   :  { %1430 = vtanh.f32 %v436_v18 }
 0x778   :  { %v1429_v19 = vpop.eup %1428 }
 0x779   :  { %441 = vrot.lane.b32.xlu0 %v1429_v19, %s1515_s15 }
 0x77a   :  { %v1431_v20 = vpop.eup %1430 }
 0x77b   :  { %443 = vrot.lane.b32.xlu1 %v1431_v20, %s1515_s15  ;;  %v1285_v20 = vld [vmem:[%s1950_s0 + $0x20] sm:$0xff]  }
 0x77f   :  { %452 = vrot.lane.b32.xlu1 %v435_v15, %s1516_s1 }
 0x7eb   :  { %v442_v21 = vpop.permute.xlu0 %441 }
 0x7ec   :  { %v1686_v23 = vmul.f32 %v1425_v4, %v442_v21  ;;  %v1268_v21 = vunpack.c.l.bf16 %v1285_v20 }
 0x7ed   :  { %v444_v22 = vpop.permute.xlu1 %443 }
 0x7ee   :  { %v1688_v24 = vmul.f32 %v1427_v7, %v444_v22  ;;  %v1269_v22 = vunpack.c.h.bf16 %v1285_v20 }
 0x7f0   :  { %v449_v25 = vpack.c.bf16 %v1688_v24, %v1686_v23 }
 0x7f1   :  { %v453_v26 = vpop.permute.xlu1 %452 }
 0x7f2   :  { %458 = vst.msk [vmem:[#allocation3] sm:$0xff] %vm31_vm1, %v453_v26  ;;  %461 = vrot.lane.b32.xlu0 %v449_v25, %s1514_s3  ;;  %v623_v25 = vadd.f32 %v1268_v21, %v1611_v13  ;;  %v624_v26 = vadd.f32 %v1269_v22, %v1611_v13 }
 0x7f6   :  { %454 = vrot.lane.b32.xlu0 %v436_v18, %s1516_s1 }
 0x7f9   :  { %v477_v45 = vld [vmem:[#allocation3] sm:$0xff] }
 0x864   :  { %v462_v27 = vpop.permute.xlu0 %461 }
 0x865   :  { %464 = vst.msk [vmem:[#allocation2] sm:$0xff] %vm31_vm1, %v462_v27 }
 0x868   :  { %v455_v28 = vpop.permute.xlu0 %454 }
 0x869   :  { %459 = vst.msk [vmem:[#allocation3 + $0x8] sm:$0xff] %vm31_vm1, %v455_v28 }
 0x86c   :  { %v476_v29 = vld [vmem:[#allocation2] sm:$0xff] }
 0x86d   :  { %1342 = vmatmul.mubr.msk.bf16.vlgmr.msra.gmra.mrb[4].mxu1 %vm31_vm1, %v476_v29 }
 0x86e   :  { %1354 = vmatpush3.bf16.msra.mxu1 %v1561_v1  ;;  %1357 = vmatprep.mubr.msk.bf16.mxu1 %vm1513_vm0, %v1512_v0 }
 0x86f   :  { %1355 = vmatprep.subr.bf16.mxu1 %v1512_v0 }
 0x870   :  { %v478_v46 = vld [vmem:[#allocation3 + $0x8] sm:$0xff] }
 0x872   :  { %1356 = vmatpush3.bf16.msra.mxu1 %v1568_v2 }
 0x873   :  { %1369 = vmatprep.subr.bf16.mxu1 %v1512_v0 }
 0x940   :  { %v523_v37 = vpop.f32.mrb[4].mxu1 }
 0x941   :  { %v530_v38 = vadd.f32 %v523_v37, %v484_v33  ;;  %v1343_v39 = vpop.f32.mrb[5].mxu1 }
 0x942   :  { %v526_v40 = vpop.f32.mrb[6].mxu1 }
 0x943   :  { %1432 = vtanh.f32 %v530_v38  ;;  %v531_v41 = vadd.f32 %v526_v40, %v485_v34  ;;  %v1344_v42 = vpop.f32.mrb[7].mxu1  ;;  %v1218_v47 = vmul.f32 -1.442695, %v530_v38 }
 0x945   :  { %1434 = vtanh.f32 %v531_v41  ;;  %v1219_v48 = vmul.f32 -1.442695, %v531_v41 }
 0x946   :  { %1436 = vpow2.f32 %v1218_v47 }
 0x947   :  { %1438 = vpow2.f32 %v1219_v48 }
 0x94d   :  { %v1433_v43 = vpop.eup %1432 }
 0x94e   :  { %558 = vrot.lane.b32.xlu1 %v1433_v43, %s1515_s15 }
 0x94f   :  { %v1435_v44 = vpop.eup %1434 }
 0x950   :  { %560 = vrot.lane.b32.xlu0 %v1435_v44, %s1515_s15  ;;  %v1437_v51 = vpop.eup %1436 }
 0x951   :  { %v1439_v52 = vpop.eup %1438  ;;  %v538_v53 = vadd.f32 1.0, %v1437_v51 }
 0x952   :  { %548 = vrot.lane.b32.xlu1 %v477_v45, %s1514_s3  ;;  %v539_v54 = vadd.f32 1.0, %v1439_v52 }
 0x953   :  { %1440 = vrcp.f32 %v538_v53 }
 0x954   :  { %550 = vrot.lane.b32.xlu0 %v478_v46, %s1514_s3  ;;  %1442 = vrcp.f32 %v539_v54 }
 0x95d   :  { %v1441_v55 = vpop.eup %1440 }
 0x95e   :  { %v1443_v58 = vpop.eup %1442 }
 0x9c0   :  { %v559_v56 = vpop.permute.xlu1 %558 }
 0x9c1   :  { %v564_v57 = vmul.f32 %v1441_v55, %v559_v56 }
 0x9c2   :  { %v561_v59 = vpop.permute.xlu0 %560 }
 0x9c3   :  { %568 = vrot.lane.b32.xlu1 %v564_v57, %s1514_s3  ;;  %v565_v60 = vmul.f32 %v1443_v58, %v561_v59 }
 0x9c4   :  { %v549_v61 = vpop.permute.xlu1 %548 }
 0x9c5   :  { %570 = vrot.lane.b32.xlu0 %v565_v60, %s1514_s3  ;;  %v554_v62 = vmul.f32 %v1441_v55, %v549_v61 }
 0x9c6   :  { %v551_v63 = vpop.permute.xlu0 %550 }
 0x9c7   :  { %v555_v5 = vmul.f32 %v1443_v58, %v551_v63 }
 0xa35   :  { %v569_v3 = vpop.permute.xlu1 %568 }
 0xa36   :  { %v574_v4 = vadd.f32 %v569_v3, %v554_v62 }
 0xa37   :  { %v571_v6 = vpop.permute.xlu0 %570 }
 0xa38   :  { %1444 = vtanh.f32 %v574_v4  ;;  %v575_v7 = vadd.f32 %v571_v6, %v555_v5 }
 0xa3a   :  { %1446 = vtanh.f32 %v575_v7 }
 0xa42   :  { %v1445_v8 = vpop.eup %1444 }
 0xa43   :  { %580 = vrot.lane.b32.xlu1 %v1445_v8, %s1515_s15 }
 0xa44   :  { %v1447_v9 = vpop.eup %1446 }
 0xa45   :  { %582 = vrot.lane.b32.xlu0 %v1447_v9, %s1515_s15 }
 0xa49   :  { %591 = vrot.lane.b32.xlu0 %v574_v4, %s1516_s1 }
 0xab5   :  { %v581_v10 = vpop.permute.xlu1 %580 }
 0xab6   :  { %v1718_v12 = vmul.f32 %v1441_v55, %v581_v10 }
 0xab7   :  { %v583_v11 = vpop.permute.xlu0 %582 }
 0xab8   :  { %v1720_v14 = vmul.f32 %v1443_v58, %v583_v11  ;;  %v1286_v11 = vld [vmem:[%s1950_s0 + $0x28] sm:$0xff]  }
 0xaba   :  { %v588_v15 = vpack.c.bf16 %v1720_v14, %v1718_v12 }
 0xabb   :  { %v592_v16 = vpop.permute.xlu0 %591 }
 0xabc   :  { %597 = vst.msk [vmem:[#allocation3] sm:$0xff] %vm31_vm1, %v592_v16  ;;  %600 = vrot.lane.b32.xlu1 %v588_v15, %s1514_s3  ;;  %v1272_v15 = vunpack.c.l.bf16 %v1286_v11  ;;  %v1273_v16 = vunpack.c.h.bf16 %v1286_v11 }
 0xac0   :  { %593 = vrot.lane.b32.xlu1 %v575_v7, %s1516_s1 }
 0xac3   :  { %v616_v37 = vld [vmem:[#allocation3] sm:$0xff] }
 0xb2e   :  { %v601_v17 = vpop.permute.xlu1 %600 }
 0xb2f   :  { %603 = vst.msk [vmem:[#allocation2] sm:$0xff] %vm31_vm1, %v601_v17  ;;  %v762_v17 = vadd.f32 %v1272_v15, %v1611_v13 }
 0xb32   :  { %v594_v18 = vpop.permute.xlu1 %593 }
 0xb33   :  { %598 = vst.msk [vmem:[#allocation3 + $0x8] sm:$0xff] %vm31_vm1, %v594_v18  ;;  %v763_v18 = vadd.f32 %v1273_v16, %v1611_v13 }
 0xb36   :  { %v615_v19 = vld [vmem:[#allocation2] sm:$0xff] }
 0xb37   :  { %1350 = vmatmul.mubr.msk.bf16.vlgmr.msra.gmra.mrb[8].mxu0 %vm31_vm1, %v615_v19 }
 0xb38   :  { %1362 = vmatpush3.bf16.msra.mxu0 %v1561_v1  ;;  %1365 = vmatprep.mubr.msk.bf16.mxu0 %vm1513_vm0, %v1512_v0 }
 0xb39   :  { %1363 = vmatprep.subr.bf16.mxu0 %v1512_v0 }
 0xb3a   :  { %v617_v38 = vld [vmem:[#allocation3 + $0x8] sm:$0xff] }
 0xb3c   :  { %1364 = vmatpush3.bf16.msra.mxu0 %v1568_v2 }
 0xc0a   :  { %v662_v27 = vpop.f32.mrb[8].mxu0 }
 0xc0b   :  { %v669_v28 = vadd.f32 %v662_v27, %v623_v25  ;;  %v1351_v29 = vpop.f32.mrb[9].mxu0 }
 0xc0c   :  { %v665_v30 = vpop.f32.mrb[10].mxu0 }
 0xc0d   :  { %1448 = vtanh.f32 %v669_v28  ;;  %v670_v31 = vadd.f32 %v665_v30, %v624_v26  ;;  %v1352_v32 = vpop.f32.mrb[11].mxu0  ;;  %v1225_v39 = vmul.f32 -1.442695, %v669_v28 }
 0xc0f   :  { %1450 = vtanh.f32 %v670_v31  ;;  %v1226_v40 = vmul.f32 -1.442695, %v670_v31 }
 0xc10   :  { %1452 = vpow2.f32 %v1225_v39 }
 0xc11   :  { %1454 = vpow2.f32 %v1226_v40 }
 0xc17   :  { %v1449_v33 = vpop.eup %1448 }
 0xc18   :  { %697 = vrot.lane.b32.xlu0 %v1449_v33, %s1515_s15 }
 0xc19   :  { %v1451_v34 = vpop.eup %1450 }
 0xc1a   :  { %699 = vrot.lane.b32.xlu1 %v1451_v34, %s1515_s15  ;;  %v1453_v41 = vpop.eup %1452 }
 0xc1b   :  { %v1455_v42 = vpop.eup %1454  ;;  %v677_v43 = vadd.f32 1.0, %v1453_v41 }
 0xc1c   :  { %687 = vrot.lane.b32.xlu0 %v616_v37, %s1514_s3  ;;  %v678_v44 = vadd.f32 1.0, %v1455_v42 }
 0xc1d   :  { %1456 = vrcp.f32 %v677_v43 }
 0xc1e   :  { %689 = vrot.lane.b32.xlu1 %v617_v38, %s1514_s3  ;;  %1458 = vrcp.f32 %v678_v44 }
 0xc27   :  { %v1457_v45 = vpop.eup %1456 }
 0xc28   :  { %v1459_v48 = vpop.eup %1458 }
 0xc8a   :  { %v698_v46 = vpop.permute.xlu0 %697 }
 0xc8b   :  { %v703_v47 = vmul.f32 %v1457_v45, %v698_v46 }
 0xc8c   :  { %v700_v51 = vpop.permute.xlu1 %699 }
 0xc8d   :  { %707 = vrot.lane.b32.xlu0 %v703_v47, %s1514_s3  ;;  %v704_v52 = vmul.f32 %v1459_v48, %v700_v51 }
 0xc8e   :  { %v688_v53 = vpop.permute.xlu0 %687 }
 0xc8f   :  { %709 = vrot.lane.b32.xlu1 %v704_v52, %s1514_s3  ;;  %v693_v54 = vmul.f32 %v1457_v45, %v688_v53 }
 0xc90   :  { %v690_v55 = vpop.permute.xlu1 %689 }
 0xc91   :  { %v694_v58 = vmul.f32 %v1459_v48, %v690_v55 }
 0xcff   :  { %v708_v56 = vpop.permute.xlu0 %707 }
 0xd00   :  { %v713_v57 = vadd.f32 %v708_v56, %v693_v54 }
 0xd01   :  { %v710_v59 = vpop.permute.xlu1 %709 }
 0xd02   :  { %1460 = vtanh.f32 %v713_v57  ;;  %v714_v60 = vadd.f32 %v710_v59, %v694_v58 }
 0xd04   :  { %1462 = vtanh.f32 %v714_v60 }
 0xd0c   :  { %v1461_v61 = vpop.eup %1460 }
 0xd0d   :  { %719 = vrot.lane.b32.xlu0 %v1461_v61, %s1515_s15 }
 0xd0e   :  { %v1463_v62 = vpop.eup %1462 }
 0xd0f   :  { %721 = vrot.lane.b32.xlu1 %v1463_v62, %s1515_s15 }
 0xd13   :  { %730 = vrot.lane.b32.xlu1 %v713_v57, %s1516_s1 }
 0xd7f   :  { %v720_v63 = vpop.permute.xlu0 %719 }
 0xd80   :  { %v1749_v4 = vmul.f32 %v1457_v45, %v720_v63  ;;  %v1287_v63 = vld [vmem:[%s1950_s0 + $0x30] sm:$0xff]  }
 0xd81   :  { %v722_v3 = vpop.permute.xlu1 %721 }
 0xd82   :  { %v1751_v5 = vmul.f32 %v1459_v48, %v722_v3  ;;  %v1276_v3 = vunpack.c.l.bf16 %v1287_v63 }
 0xd84   :  { %v727_v6 = vpack.c.bf16 %v1751_v5, %v1749_v4 }
 0xd85   :  { %v731_v7 = vpop.permute.xlu1 %730 }
 0xd86   :  { %736 = vst.msk [vmem:[#allocation3] sm:$0xff] %vm31_vm1, %v731_v7  ;;  %739 = vrot.lane.b32.xlu0 %v727_v6, %s1514_s3  ;;  %v1277_v6 = vunpack.c.h.bf16 %v1287_v63  ;;  %v901_v7 = vadd.f32 %v1276_v3, %v1611_v13 }
 0xd8a   :  { %732 = vrot.lane.b32.xlu0 %v714_v60, %s1516_s1 }
 0xd8d   :  { %v755_v26 = vld [vmem:[#allocation3] sm:$0xff] }
 0xdf8   :  { %v740_v8 = vpop.permute.xlu0 %739 }
 0xdf9   :  { %742 = vst.msk [vmem:[#allocation2] sm:$0xff] %vm31_vm1, %v740_v8  ;;  %v902_v8 = vadd.f32 %v1277_v6, %v1611_v13 }
 0xdfc   :  { %v733_v9 = vpop.permute.xlu0 %732 }
 0xdfd   :  { %737 = vst.msk [vmem:[#allocation3 + $0x8] sm:$0xff] %vm31_vm1, %v733_v9 }
 0xe00   :  { %v754_v10 = vld [vmem:[#allocation2] sm:$0xff] }
 0xe01   :  { %1358 = vmatmul.mubr.msk.bf16.vlgmr.msra.gmra.mrb[8].mxu1 %vm31_vm1, %v754_v10 }
 0xe02   :  { %1370 = vmatpush3.bf16.msra.mxu1 %v1561_v1  ;;  %1373 = vmatprep.mubr.msk.bf16.mxu1 %vm1513_vm0, %v1512_v0 }
 0xe03   :  { %1371 = vmatprep.subr.bf16.mxu1 %v1512_v0 }
 0xe04   :  { %v756_v27 = vld [vmem:[#allocation3 + $0x8] sm:$0xff] }
 0xe06   :  { %1372 = vmatpush3.bf16.msra.mxu1 %v1568_v2 }
 0xed4   :  { %v801_v19 = vpop.f32.mrb[8].mxu1 }
 0xed5   :  { %v808_v20 = vadd.f32 %v801_v19, %v762_v17  ;;  %v1359_v1 = vpop.f32.mrb[9].mxu1 }
 0xed6   :  { %v804_v21 = vpop.f32.mrb[10].mxu1 }
 0xed7   :  { %1464 = vtanh.f32 %v808_v20  ;;  %v809_v22 = vadd.f32 %v804_v21, %v763_v18  ;;  %v1360_v25 = vpop.f32.mrb[11].mxu1  ;;  %v1232_v28 = vmul.f32 -1.442695, %v808_v20 }
 0xed9   :  { %1466 = vtanh.f32 %v809_v22  ;;  %v1233_v29 = vmul.f32 -1.442695, %v809_v22 }
 0xeda   :  { %1468 = vpow2.f32 %v1232_v28 }
 0xedb   :  { %1470 = vpow2.f32 %v1233_v29 }
 0xee1   :  { %v1465_v0 = vpop.eup %1464 }
 0xee2   :  { %836 = vrot.lane.b32.xlu1 %v1465_v0, %s1515_s15 }
 0xee3   :  { %v1467_v2 = vpop.eup %1466 }
 0xee4   :  { %838 = vrot.lane.b32.xlu0 %v1467_v2, %s1515_s15  ;;  %v1469_v30 = vpop.eup %1468 }
 0xee5   :  { %v1471_v31 = vpop.eup %1470  ;;  %v816_v32 = vadd.f32 1.0, %v1469_v30 }
 0xee6   :  { %826 = vrot.lane.b32.xlu1 %v755_v26, %s1514_s3  ;;  %v817_v33 = vadd.f32 1.0, %v1471_v31 }
 0xee7   :  { %1472 = vrcp.f32 %v816_v32 }
 0xee8   :  { %828 = vrot.lane.b32.xlu0 %v756_v27, %s1514_s3  ;;  %1474 = vrcp.f32 %v817_v33 }
 0xef1   :  { %v1473_v34 = vpop.eup %1472 }
 0xef2   :  { %v1475_v39 = vpop.eup %1474 }
 0xf54   :  { %v837_v37 = vpop.permute.xlu1 %836 }
 0xf55   :  { %v842_v38 = vmul.f32 %v1473_v34, %v837_v37 }
 0xf56   :  { %v839_v40 = vpop.permute.xlu0 %838 }
 0xf57   :  { %846 = vrot.lane.b32.xlu1 %v842_v38, %s1514_s3  ;;  %v843_v41 = vmul.f32 %v1475_v39, %v839_v40 }
 0xf58   :  { %v827_v42 = vpop.permute.xlu1 %826 }
 0xf59   :  { %848 = vrot.lane.b32.xlu0 %v843_v41, %s1514_s3  ;;  %v832_v43 = vmul.f32 %v1473_v34, %v827_v42 }
 0xf5a   :  { %v829_v44 = vpop.permute.xlu0 %828 }
 0xf5b   :  { %v833_v47 = vmul.f32 %v1475_v39, %v829_v44 }
 0xfc9   :  { %v847_v45 = vpop.permute.xlu1 %846 }
 0xfca   :  { %v852_v46 = vadd.f32 %v847_v45, %v832_v43 }
 0xfcb   :  { %v849_v48 = vpop.permute.xlu0 %848 }
 0xfcc   :  { %1476 = vtanh.f32 %v852_v46  ;;  %v853_v51 = vadd.f32 %v849_v48, %v833_v47 }
 0xfce   :  { %1478 = vtanh.f32 %v853_v51 }
 0xfd6   :  { %v1477_v52 = vpop.eup %1476 }
 0xfd7   :  { %858 = vrot.lane.b32.xlu1 %v1477_v52, %s1515_s15 }
 0xfd8   :  { %v1479_v53 = vpop.eup %1478 }
 0xfd9   :  { %860 = vrot.lane.b32.xlu0 %v1479_v53, %s1515_s15 }
 0xfdd   :  { %869 = vrot.lane.b32.xlu0 %v852_v46, %s1516_s1 }
0x1049   :  { %v859_v54 = vpop.permute.xlu1 %858 }
0x104a   :  { %v1780_v56 = vmul.f32 %v1473_v34, %v859_v54 }
0x104b   :  { %v861_v55 = vpop.permute.xlu0 %860 }
0x104c   :  { %v1782_v57 = vmul.f32 %v1475_v39, %v861_v55 }
0x104e   :  { %v866_v58 = vpack.c.bf16 %v1782_v57, %v1780_v56 }
0x104f   :  { %v870_v59 = vpop.permute.xlu0 %869 }
0x1050   :  { %875 = vst.msk [vmem:[#allocation3] sm:$0xff] %vm31_vm1, %v870_v59  ;;  %878 = vrot.lane.b32.xlu1 %v866_v58, %s1514_s3  ;;  %v1288_v58 = vld [vmem:[%s1950_s0 + $0x38] sm:$0xff]  }
0x1051   :  { %v1280_v59 = vunpack.c.l.bf16 %v1288_v58 }
0x1054   :  { %871 = vrot.lane.b32.xlu1 %v853_v51, %s1516_s1 }
0x1057   :  { %v894_v20 = vld [vmem:[#allocation3] sm:$0xff] }
0x10c2   :  { %v879_v60 = vpop.permute.xlu1 %878 }
0x10c3   :  { %881 = vst.msk [vmem:[#allocation2] sm:$0xff] %vm31_vm1, %v879_v60  ;;  %v1281_v60 = vunpack.c.h.bf16 %v1288_v58 }
0x10c6   :  { %v872_v61 = vpop.permute.xlu1 %871 }
0x10c7   :  { %876 = vst.msk [vmem:[#allocation3 + $0x8] sm:$0xff] %vm31_vm1, %v872_v61  ;;  %v1040_v61 = vadd.f32 %v1280_v59, %v1611_v13 }
0x10ca   :  { %v893_v62 = vld [vmem:[#allocation2] sm:$0xff] }
0x10cb   :  { %1366 = vmatmul.mubr.msk.bf16.vlgmr.msra.gmra.mrb[12].mxu0 %vm31_vm1, %v893_v62  ;;  %v1041_v62 = vadd.f32 %v1281_v60, %v1611_v13 }
0x10ce   :  { %v895_v1 = vld [vmem:[#allocation3 + $0x8] sm:$0xff] }
0x119e   :  { %v940_v9 = vpop.f32.mrb[12].mxu0 }
0x119f   :  { %v947_v10 = vadd.f32 %v940_v9, %v901_v7  ;;  %v1367_v11 = vpop.f32.mrb[13].mxu0 }
0x11a0   :  { %v943_v15 = vpop.f32.mrb[14].mxu0 }
0x11a1   :  { %1480 = vtanh.f32 %v947_v10  ;;  %v948_v16 = vadd.f32 %v943_v15, %v902_v8  ;;  %v1368_v17 = vpop.f32.mrb[15].mxu0  ;;  %v1239_v21 = vmul.f32 -1.442695, %v947_v10 }
0x11a3   :  { %1482 = vtanh.f32 %v948_v16  ;;  %v1240_v22 = vmul.f32 -1.442695, %v948_v16 }
0x11a4   :  { %1484 = vpow2.f32 %v1239_v21 }
0x11a5   :  { %1486 = vpow2.f32 %v1240_v22 }
0x11ab   :  { %v1481_v18 = vpop.eup %1480 }
0x11ac   :  { %975 = vrot.lane.b32.xlu0 %v1481_v18, %s1515_s15 }
0x11ad   :  { %v1483_v19 = vpop.eup %1482 }
0x11ae   :  { %977 = vrot.lane.b32.xlu1 %v1483_v19, %s1515_s15  ;;  %v1485_v25 = vpop.eup %1484 }
0x11af   :  { %v1487_v0 = vpop.eup %1486  ;;  %v955_v2 = vadd.f32 1.0, %v1485_v25 }
0x11b0   :  { %965 = vrot.lane.b32.xlu0 %v894_v20, %s1514_s3  ;;  %v956_v26 = vadd.f32 1.0, %v1487_v0 }
0x11b1   :  { %1488 = vrcp.f32 %v955_v2 }
0x11b2   :  { %967 = vrot.lane.b32.xlu1 %v895_v1, %s1514_s3  ;;  %1490 = vrcp.f32 %v956_v26 }
0x11bb   :  { %v1489_v27 = vpop.eup %1488 }
0x11bc   :  { %v1491_v30 = vpop.eup %1490 }
0x121e   :  { %v976_v28 = vpop.permute.xlu0 %975 }
0x121f   :  { %v981_v29 = vmul.f32 %v1489_v27, %v976_v28 }
0x1220   :  { %v978_v31 = vpop.permute.xlu1 %977 }
0x1221   :  { %985 = vrot.lane.b32.xlu0 %v981_v29, %s1514_s3  ;;  %v982_v32 = vmul.f32 %v1491_v30, %v978_v31 }
0x1222   :  { %v966_v33 = vpop.permute.xlu0 %965 }
0x1223   :  { %987 = vrot.lane.b32.xlu1 %v982_v32, %s1514_s3  ;;  %v971_v34 = vmul.f32 %v1489_v27, %v966_v33 }
0x1224   :  { %v968_v37 = vpop.permute.xlu1 %967 }
0x1225   :  { %v972_v40 = vmul.f32 %v1491_v30, %v968_v37 }
0x1293   :  { %v986_v38 = vpop.permute.xlu0 %985 }
0x1294   :  { %v991_v39 = vadd.f32 %v986_v38, %v971_v34 }
0x1295   :  { %v988_v41 = vpop.permute.xlu1 %987 }
0x1296   :  { %1492 = vtanh.f32 %v991_v39  ;;  %v992_v42 = vadd.f32 %v988_v41, %v972_v40 }
0x1298   :  { %1494 = vtanh.f32 %v992_v42 }
0x12a0   :  { %v1493_v43 = vpop.eup %1492 }
0x12a1   :  { %997 = vrot.lane.b32.xlu0 %v1493_v43, %s1515_s15 }
0x12a2   :  { %v1495_v44 = vpop.eup %1494 }
0x12a3   :  { %999 = vrot.lane.b32.xlu1 %v1495_v44, %s1515_s15 }
0x12a7   :  { %1008 = vrot.lane.b32.xlu1 %v991_v39, %s1516_s1 }
0x1313   :  { %v998_v45 = vpop.permute.xlu0 %997 }
0x1314   :  { %v1806_v47 = vmul.f32 %v1489_v27, %v998_v45 }
0x1315   :  { %v1000_v46 = vpop.permute.xlu1 %999 }
0x1316   :  { %v1808_v48 = vmul.f32 %v1491_v30, %v1000_v46 }
0x1318   :  { %v1005_v51 = vpack.c.bf16 %v1808_v48, %v1806_v47 }
0x1319   :  { %v1009_v52 = vpop.permute.xlu1 %1008 }
0x131a   :  { %1014 = vst.msk [vmem:[#allocation3] sm:$0xff] %vm31_vm1, %v1009_v52  ;;  %1017 = vrot.lane.b32.xlu0 %v1005_v51, %s1514_s3 }
0x131e   :  { %1010 = vrot.lane.b32.xlu0 %v992_v42, %s1516_s1 }
0x1321   :  { %v1033_v15 = vld [vmem:[#allocation3] sm:$0xff] }
0x138c   :  { %v1018_v53 = vpop.permute.xlu0 %1017 }
0x138d   :  { %1020 = vst.msk [vmem:[#allocation2] sm:$0xff] %vm31_vm1, %v1018_v53 }
0x1390   :  { %v1011_v54 = vpop.permute.xlu0 %1010 }
0x1391   :  { %1015 = vst.msk [vmem:[#allocation3 + $0x8] sm:$0xff] %vm31_vm1, %v1011_v54 }
0x1394   :  { %v1032_v55 = vld [vmem:[#allocation2] sm:$0xff] }
0x1395   :  { %1374 = vmatmul.mubr.msk.bf16.vlgmr.msra.gmra.mrb[12].mxu1 %vm31_vm1, %v1032_v55 }
0x1398   :  { %v1034_v16 = vld [vmem:[#allocation3 + $0x8] sm:$0xff] }
0x1468   :  { %v1079_v63 = vpop.f32.mrb[12].mxu1 }
0x1469   :  { %v1086_v3 = vadd.f32 %v1079_v63, %v1040_v61  ;;  %v1375_v6 = vpop.f32.mrb[13].mxu1 }
0x146a   :  { %v1082_v7 = vpop.f32.mrb[14].mxu1 }
0x146b   :  { %1496 = vtanh.f32 %v1086_v3  ;;  %v1087_v8 = vadd.f32 %v1082_v7, %v1041_v62  ;;  %v1376_v9 = vpop.f32.mrb[15].mxu1  ;;  %v1246_v13 = vmul.f32 -1.442695, %v1086_v3 }
0x146d   :  { %1498 = vtanh.f32 %v1087_v8  ;;  %v1247_v17 = vmul.f32 -1.442695, %v1087_v8 }
0x146e   :  { %1500 = vpow2.f32 %v1246_v13 }
0x146f   :  { %1502 = vpow2.f32 %v1247_v17 }
0x1475   :  { %v1497_v10 = vpop.eup %1496 }
0x1476   :  { %1114 = vrot.lane.b32.xlu1 %v1497_v10, %s1515_s15 }
0x1477   :  { %v1499_v11 = vpop.eup %1498 }
0x1478   :  { %1116 = vrot.lane.b32.xlu0 %v1499_v11, %s1515_s15  ;;  %v1501_v18 = vpop.eup %1500 }
0x1479   :  { %v1503_v19 = vpop.eup %1502  ;;  %v1094_v20 = vadd.f32 1.0, %v1501_v18 }
0x147a   :  { %1104 = vrot.lane.b32.xlu1 %v1033_v15, %s1514_s3  ;;  %v1095_v1 = vadd.f32 1.0, %v1503_v19 }
0x147b   :  { %1504 = vrcp.f32 %v1094_v20 }
0x147c   :  { %1106 = vrot.lane.b32.xlu0 %v1034_v16, %s1514_s3  ;;  %1506 = vrcp.f32 %v1095_v1 }
0x1485   :  { %v1505_v21 = vpop.eup %1504 }
0x1486   :  { %v1507_v0 = vpop.eup %1506 }
0x14e8   :  { %v1115_v22 = vpop.permute.xlu1 %1114 }
0x14e9   :  { %v1120_v25 = vmul.f32 %v1505_v21, %v1115_v22 }
0x14ea   :  { %v1117_v2 = vpop.permute.xlu0 %1116 }
0x14eb   :  { %1124 = vrot.lane.b32.xlu1 %v1120_v25, %s1514_s3  ;;  %v1121_v26 = vmul.f32 %v1507_v0, %v1117_v2 }
0x14ec   :  { %v1105_v27 = vpop.permute.xlu1 %1104 }
0x14ed   :  { %1126 = vrot.lane.b32.xlu0 %v1121_v26, %s1514_s3  ;;  %v1110_v28 = vmul.f32 %v1505_v21, %v1105_v27 }
0x14ee   :  { %v1107_v29 = vpop.permute.xlu0 %1106 }
0x14ef   :  { %v1111_v32 = vmul.f32 %v1507_v0, %v1107_v29 }
0x155d   :  { %v1125_v30 = vpop.permute.xlu1 %1124 }
0x155e   :  { %v1130_v31 = vadd.f32 %v1125_v30, %v1110_v28 }
0x155f   :  { %v1127_v33 = vpop.permute.xlu0 %1126 }
0x1560   :  { %1508 = vtanh.f32 %v1130_v31  ;;  %v1131_v34 = vadd.f32 %v1127_v33, %v1111_v32 }
0x1562   :  { %1510 = vtanh.f32 %v1131_v34 }
0x156a   :  { %v1509_v37 = vpop.eup %1508 }
0x156b   :  { %1136 = vrot.lane.b32.xlu1 %v1509_v37, %s1515_s15 }
0x156c   :  { %v1511_v38 = vpop.eup %1510 }
0x156d   :  { %1138 = vrot.lane.b32.xlu0 %v1511_v38, %s1515_s15 }
0x156f   :  { %1149 = vrot.lane.b32.xlu1 %v1131_v34, %s1516_s1 }
0x1571   :  { %1147 = vrot.lane.b32.xlu0 %v1130_v31, %s1516_s1 }
0x1573   :  { %192 = vrot.lane.b32.xlu1 %v1624_v50, %s1514_s3 }
0x1575   :  { %190 = vrot.lane.b32.xlu0 %v1622_v49, %s1514_s3 }
0x1577   :  { %330 = vrot.lane.b32.xlu1 %v1656_v36, %s1514_s3 }
0x1579   :  { %328 = vrot.lane.b32.xlu0 %v1654_v35, %s1514_s3 }
0x157b   :  { %469 = vrot.lane.b32.xlu1 %v1688_v24, %s1514_s3 }
0x157d   :  { %467 = vrot.lane.b32.xlu0 %v1686_v23, %s1514_s3 }
0x157f   :  { %608 = vrot.lane.b32.xlu1 %v1720_v14, %s1514_s3 }
0x1581   :  { %606 = vrot.lane.b32.xlu0 %v1718_v12, %s1514_s3 }
0x1583   :  { %747 = vrot.lane.b32.xlu1 %v1751_v5, %s1514_s3 }
0x1585   :  { %745 = vrot.lane.b32.xlu0 %v1749_v4, %s1514_s3 }
0x1589   :  { %884 = vrot.lane.b32.xlu0 %v1780_v56, %s1514_s3 }
0x158d   :  { %1023 = vrot.lane.b32.xlu0 %v1806_v47, %s1514_s3 }
0x15dd   :  { %v1137_v49 = vpop.permute.xlu1 %1136 }
0x15de   :  { %v1142_v50 = vmul.f32 %v1505_v21, %v1137_v49 }
0x15df   :  { %v1139_v35 = vpop.permute.xlu0 %1138 }
0x15e0   :  { %1162 = vrot.lane.b32.xlu0 %v1142_v50, %s1514_s3  ;;  %v1143_v36 = vmul.f32 %v1507_v0, %v1139_v35 }
0x15e1   :  { %v1150_v23 = vpop.permute.xlu1 %1149 }
0x15e2   :  { %1154 = vst.msk [vmem:[#allocation3 + $0x8] sm:$0xff] %vm31_vm1, %v1150_v23  ;;  %v1144_v24 = vpack.c.bf16 %v1143_v36, %v1142_v50 }
0x15e3   :  { %v1148_v12 = vpop.permute.xlu0 %1147 }
0x15e4   :  { %1153 = vst.msk [vmem:[#allocation3] sm:$0xff] %vm31_vm1, %v1148_v12  ;;  %1156 = vrot.lane.b32.xlu1 %v1144_v24, %s1514_s3 }
0x15e5   :  { %v193_v14 = vpop.permute.xlu1 %192 }
0x15e6   :  { %197 = vst.msk [vmem:[%s1952_s5 + $0x8] sm:$0xff] %vm31_vm1, %v193_v14 }
0x15e7   :  { %v191_v4 = vpop.permute.xlu0 %190 }
0x15e8   :  { %196 = vst.msk [vmem:[%s1952_s5] sm:$0xff] %vm31_vm1, %v191_v4  ;;  %886 = vrot.lane.b32.xlu1 %v1782_v57, %s1514_s3 }
0x15e9   :  { %v1180_v5 = vld [vmem:[#allocation3 + $0x8] sm:$0xff]  ;;  %v331_v56 = vpop.permute.xlu1 %330 }
0x15ea   :  { %1182 = vst.msk [vmem:[%s1953_s7 + $0x8] sm:$0xff] %vm31_vm1, %v1180_v5  ;;  %1207 = vst.msk [vmem:[%s1952_s5 + $0x18] sm:$0xff] %vm31_vm1, %v331_v56 }
0x15eb   :  { %v1179_v39 = vld [vmem:[#allocation3] sm:$0xff]  ;;  %v329_v40 = vpop.permute.xlu0 %328 }
0x15ec   :  { %1181 = vst.msk [vmem:[%s1953_s7] sm:$0xff] %vm31_vm1, %v1179_v39  ;;  %1206 = vst.msk [vmem:[%s1952_s5 + $0x10] sm:$0xff] %vm31_vm1, %v329_v40  ;;  %1025 = vrot.lane.b32.xlu1 %v1808_v48, %s1514_s3 }
0x15ed   :  { %v470_v57 = vpop.permute.xlu1 %469 }
0x15ee   :  { %1214 = vst.msk [vmem:[%s1952_s5 + $0x28] sm:$0xff] %vm31_vm1, %v470_v57 }
0x15ef   :  { %v468_v41 = vpop.permute.xlu0 %467 }
0x15f0   :  { %1213 = vst.msk [vmem:[%s1952_s5 + $0x20] sm:$0xff] %vm31_vm1, %v468_v41  ;;  %1164 = vrot.lane.b32.xlu1 %v1143_v36, %s1514_s3 }
0x15f1   :  { %v609_v42 = vpop.permute.xlu1 %608 }
0x15f2   :  { %1221 = vst.msk [vmem:[%s1952_s5 + $0x38] sm:$0xff] %vm31_vm1, %v609_v42 }
0x15f3   :  { %v607_v43 = vpop.permute.xlu0 %606 }
0x15f4   :  { %1220 = vst.msk [vmem:[%s1952_s5 + $0x30] sm:$0xff] %vm31_vm1, %v607_v43 }
0x15f5   :  { %v748_v44 = vpop.permute.xlu1 %747 }
0x15f6   :  { %1228 = vst.msk [vmem:[%s1952_s5 + $0x48] sm:$0xff] %vm31_vm1, %v748_v44 }
0x15f7   :  { %v746_v45 = vpop.permute.xlu0 %745 }
0x15f8   :  { %1227 = vst.msk [vmem:[%s1952_s5 + $0x40] sm:$0xff] %vm31_vm1, %v746_v45 }
0x15fb   :  { %v885_v46 = vpop.permute.xlu0 %884 }
0x15fc   :  { %1234 = vst.msk [vmem:[%s1952_s5 + $0x50] sm:$0xff] %vm31_vm1, %v885_v46 }
0x15ff   :  { %v1024_v47 = vpop.permute.xlu0 %1023 }
0x1600   :  { %1241 = vst.msk [vmem:[%s1952_s5 + $0x60] sm:$0xff] %vm31_vm1, %v1024_v47 }
0x1652   :  { %v1163_v48 = vpop.permute.xlu0 %1162 }
0x1653   :  { %1248 = vst.msk [vmem:[%s1952_s5 + $0x70] sm:$0xff] %vm31_vm1, %v1163_v48 }
0x1656   :  { %v1157_v51 = vpop.permute.xlu1 %1156 }
0x1657   :  { %1159 = vst.msk [vmem:[#allocation2] sm:$0xff] %vm31_vm1, %v1157_v51 }
0x165a   :  { %v887_v52 = vpop.permute.xlu1 %886 }
0x165b   :  { %1235 = vst.msk [vmem:[%s1952_s5 + $0x58] sm:$0xff] %vm31_vm1, %v887_v52 }
0x165e   :  { %v1174_v53 = vld [vmem:[#allocation2] sm:$0xff]  ;;  %v1026_v54 = vpop.permute.xlu1 %1025 }
0x165f   :  { %v1175_v55 = vunpack.c.l.bf16 %v1174_v53  ;;  %v1176_v58 = vunpack.c.h.bf16 %v1174_v53  ;;  %1242 = vst.msk [vmem:[%s1952_s5 + $0x68] sm:$0xff] %vm31_vm1, %v1026_v54 }
0x1661   :  { %1177 = vst.msk [vmem:[%s1954_s6] sm:$0xff] %vm31_vm1, %v1175_v55  ;;  %1178 = vst.msk [vmem:[%s1954_s6 + $0x8] sm:$0xff] %vm31_vm1, %v1176_v58 }
0x1662   :  { %v1165_v59 = vpop.permute.xlu1 %1164 }
0x1663   :  { %1249 = vst.msk [vmem:[%s1952_s5 + $0x78] sm:$0xff] %vm31_vm1, %v1165_v59 }

</bundles_post_ra>
